<compile_context>
chip_gen: v7x
topology: tpu7x:2x2x1
jax: 0.10.0
libtpu: 0.0.40
codegen_flags: <defaults>
</compile_context>

<pallas_src>
import jax
import jax.numpy as jnp
from jax.experimental import pallas as pl
from jax.experimental.pallas import tpu as pltpu

IN_FEATURES = 28 * 28      # 784
HIDDEN = 512
OUT_FEATURES = 10
OUT_PAD = 128              # lane-dense padded output width
MAX_TILE_B = 512           # batch tile for large B


def _round_up(x, m):
    return (x + m - 1) // m * m


def _cdiv(a, b):
    return -(-a // b)


def mlp_kernel(x_ref, w1_ref, b1_ref, w2_ref, b2_ref, w3_ref, b3_ref, o_ref):
    # In-kernel f32 -> bf16 cast of the activation tile (VPU, hidden by MXU).
    x = x_ref[...].astype(jnp.bfloat16)
    # Layer 1: (TB, 784)bf16 @ (784, 512)bf16 -> f32 acc; bias + ReLU in f32.
    h1 = jnp.dot(x, w1_ref[...], preferred_element_type=jnp.float32)
    h1 = jnp.maximum(h1 + b1_ref[...], 0.0).astype(jnp.bfloat16)
    # Layer 2: (TB, 512)bf16 @ (512, 512)bf16 -> f32 acc; bias + ReLU in f32.
    h2 = jnp.dot(h1, w2_ref[...], preferred_element_type=jnp.float32)
    h2 = jnp.maximum(h2 + b2_ref[...], 0.0).astype(jnp.bfloat16)
    # Layer 3: (TB, 512)bf16 @ (512, 128)bf16 -> f32 acc; lane-dense store.
    logits = jnp.dot(h2, w3_ref[...], preferred_element_type=jnp.float32)
    o_ref[...] = (logits + b3_ref[...]).astype(o_ref.dtype)


def prepare_params(w1, b1, w2, b2, w3, b3):
    """One-time weight prep (hoisted out of the per-call forward).

    Weights are (in_features, out_features) — transposed vs torch nn.Linear.
    """
    w1_p = w1.astype(jnp.bfloat16)                               # (784, 512)
    w2_p = w2.astype(jnp.bfloat16)                               # (512, 512)
    w3_p = jnp.zeros((HIDDEN, OUT_PAD), jnp.bfloat16)
    w3_p = w3_p.at[:, :OUT_FEATURES].set(w3.astype(jnp.bfloat16))
    b1_p = b1.reshape(1, HIDDEN).astype(jnp.float32)             # biases stay f32
    b2_p = b2.reshape(1, HIDDEN).astype(jnp.float32)
    b3_p = jnp.zeros((1, OUT_PAD), jnp.float32)
    b3_p = b3_p.at[:, :OUT_FEATURES].set(
        b3.reshape(1, OUT_FEATURES).astype(jnp.float32))
    return w1_p, b1_p, w2_p, b2_p, w3_p, b3_p


@jax.jit
def neural_network_forward(x, w1, b1, w2, b2, w3, b3):
    """x: (B, 1, 28, 28) or (B, 28, 28) f32; params from prepare_params().
    Returns (B, 10) f32 logits."""
    B = x.shape[0]
    x_flat = x.reshape(B, -1).astype(jnp.float32)                # nn.Flatten()
    assert x_flat.shape[1] == IN_FEATURES

    # --- batch tiling --------------------------------------------------------
    if B <= MAX_TILE_B:
        # Single grid step; block equals full array dims (always legal).
        tile_b = B
    else:
        # Even number of grid steps so v7x's 2 TensorCores both get work;
        # tiles rounded to 16 rows for bf16 sublane packing.
        pairs = _cdiv(B, 2 * MAX_TILE_B)
        tile_b = _round_up(_cdiv(B, 2 * pairs), 16)
    num_tiles = _cdiv(B, tile_b)

    const = lambda i: (0, 0)     # weights/biases VMEM-resident across steps

    flops = 2 * B * (IN_FEATURES * HIDDEN + HIDDEN * HIDDEN + HIDDEN * OUT_PAD)
    bytes_accessed = (
        B * IN_FEATURES * 4                       # x (f32, read once)
        + (w1.size + w2.size + w3.size) * 2       # bf16 weights
        + (b1.size + b2.size + b3.size) * 4       # f32 biases
        + B * OUT_PAD * 4                         # padded f32 logits
    )

    out = pl.pallas_call(
        mlp_kernel,
        out_shape=jax.ShapeDtypeStruct((B, OUT_PAD), jnp.float32),
        grid=(num_tiles,),
        in_specs=[
            pl.BlockSpec((tile_b, IN_FEATURES), lambda i: (i, 0)),  # x tile
            pl.BlockSpec((IN_FEATURES, HIDDEN), const),             # w1 (resident)
            pl.BlockSpec((1, HIDDEN), const),                       # b1
            pl.BlockSpec((HIDDEN, HIDDEN), const),                  # w2 (resident)
            pl.BlockSpec((1, HIDDEN), const),                       # b2
            pl.BlockSpec((HIDDEN, OUT_PAD), const),                 # w3 (resident)
            pl.BlockSpec((1, OUT_PAD), const),                      # b3
        ],
        out_specs=pl.BlockSpec((tile_b, OUT_PAD), lambda i: (i, 0)),
        compiler_params=pltpu.CompilerParams(
            dimension_semantics=("parallel",),     # v7x: shard batch over 2 TCs
        ),
        cost_estimate=pl.CostEstimate(
            flops=flops, transcendentals=0, bytes_accessed=bytes_accessed
        ),
    )(x_flat, w1, b1, w2, b2, w3, b3)

    return out[:, :OUT_FEATURES]


def init_params(key):
    """Deterministic init mimicking nn.Linear's U(-1/sqrt(fan_in), 1/sqrt(fan_in))."""
    keys = jax.random.split(key, 6)

    def linear(kw, kb, fan_in, fan_out):
        bound = 1.0 / jnp.sqrt(fan_in)
        w = jax.random.uniform(kw, (fan_in, fan_out), jnp.float32, -bound, bound)
        b = jax.random.uniform(kb, (1, fan_out), jnp.float32, -bound, bound)
        return w, b

    w1, b1 = linear(keys[0], keys[1], IN_FEATURES, HIDDEN)
    w2, b2 = linear(keys[2], keys[3], HIDDEN, HIDDEN)
    w3, b3 = linear(keys[4], keys[5], HIDDEN, OUT_FEATURES)
    return w1, b1, w2, b2, w3, b3


if __name__ == "__main__":
    key = jax.random.PRNGKey(0)
    k_x, k_p = jax.random.split(key)

    B = 2
    x = jax.random.normal(k_x, (B, 1, 28, 28), dtype=jnp.float32)
    raw_params = init_params(k_p)

    # One-time weight prep (outside the per-call forward, per perf feedback).
    prepared = prepare_params(*raw_params)
    prepared = jax.block_until_ready(prepared)

    logits = neural_network_forward(x, *prepared)
    logits = jax.block_until_ready(logits)
    assert logits.shape == (B, OUT_FEATURES)

    # Reference with the SAME bf16 quantization / f32 accumulation so the
    # comparison isolates kernel correctness (not bf16 rounding).
    w1, b1, w2, b2, w3, b3 = raw_params
    xf = x.reshape(B, -1).astype(jnp.bfloat16)
    w1b, w2b, w3b = (w.astype(jnp.bfloat16) for w in (w1, w2, w3))
    ref = jnp.maximum(
        jnp.dot(xf, w1b, preferred_element_type=jnp.float32) + b1, 0.0
    ).astype(jnp.bfloat16)
    ref = jnp.maximum(
        jnp.dot(ref, w2b, preferred_element_type=jnp.float32) + b2, 0.0
    ).astype(jnp.bfloat16)
    ref = jnp.dot(ref, w3b, preferred_element_type=jnp.float32) + b3

    assert jnp.allclose(logits, ref, atol=2e-2, rtol=2e-2), (
        jnp.max(jnp.abs(logits - ref))
    )

    print("KERNEL_OK")
</pallas_src>

<mosaic_0001>
module attributes {stable_mosaic.version = 11 : i64} {
  func.func @mlp_kernel(%arg0: i32, %arg1: memref<2x784xf32, #tpu.memory_space<vmem>>, %arg2: memref<784x512xbf16, #tpu.memory_space<vmem>>, %arg3: memref<1x512xf32, #tpu.memory_space<vmem>>, %arg4: memref<512x512xbf16, #tpu.memory_space<vmem>>, %arg5: memref<1x512xf32, #tpu.memory_space<vmem>>, %arg6: memref<512x128xbf16, #tpu.memory_space<vmem>>, %arg7: memref<1x128xf32, #tpu.memory_space<vmem>>, %arg8: memref<2x128xf32, #tpu.memory_space<vmem>>) attributes {dimension_semantics = [#tpu.dimension_semantics<parallel>], iteration_bounds = array<i64: 1>, scalar_prefetch = 0 : i64, scratch_operands = 0 : i64, tpu.core_type = #tpu.core_type<tc>, window_params = [{transform_indices = @transform_0, window_bounds = array<i64: 2, 784>}, {pipeline_mode = #tpu.pipeline_mode<synchronous>, transform_indices = @transform_1, window_bounds = array<i64: 784, 512>}, {pipeline_mode = #tpu.pipeline_mode<synchronous>, transform_indices = @transform_2, window_bounds = array<i64: 1, 512>}, {pipeline_mode = #tpu.pipeline_mode<synchronous>, transform_indices = @transform_3, window_bounds = array<i64: 512, 512>}, {pipeline_mode = #tpu.pipeline_mode<synchronous>, transform_indices = @transform_4, window_bounds = array<i64: 1, 512>}, {pipeline_mode = #tpu.pipeline_mode<synchronous>, transform_indices = @transform_5, window_bounds = array<i64: 512, 128>}, {pipeline_mode = #tpu.pipeline_mode<synchronous>, transform_indices = @transform_6, window_bounds = array<i64: 1, 128>}, {transform_indices = @transform_7, window_bounds = array<i64: 2, 128>}]} {
    %c0 = arith.constant 0 : index
    %c0_0 = arith.constant 0 : index
    %0 = vector.load %arg1[%c0, %c0_0] : memref<2x784xf32, #tpu.memory_space<vmem>>, vector<2x784xf32>
    %1 = arith.truncf %0 : vector<2x784xf32> to vector<2x784xbf16>
    %c0_1 = arith.constant 0 : index
    %c0_2 = arith.constant 0 : index
    %2 = vector.load %arg2[%c0_1, %c0_2] : memref<784x512xbf16, #tpu.memory_space<vmem>>, vector<784x512xbf16>
    %cst = arith.constant dense<0.000000e+00> : vector<2x512xf32>
    %3 = tpu.matmul %1, %2, %cst {dimension_numbers = #tpu.dot_dimension_numbers<[1], [0], [0], [1], [0, 0, 1, 1], [], []>} : vector<2x784xbf16>, vector<784x512xbf16>, vector<2x512xf32> -> vector<2x512xf32>
    %c0_3 = arith.constant 0 : index
    %c0_4 = arith.constant 0 : index
    %4 = vector.load %arg3[%c0_3, %c0_4] : memref<1x512xf32, #tpu.memory_space<vmem>>, vector<1x512xf32>
    %5 = vector.broadcast %4 : vector<1x512xf32> to vector<2x512xf32>
    %6 = arith.addf %3, %5 : vector<2x512xf32>
    %cst_5 = arith.constant 0.000000e+00 : f32
    %7 = vector.broadcast %cst_5 : f32 to vector<2x512xf32>
    %8 = arith.maximumf %6, %7 : vector<2x512xf32>
    %9 = arith.truncf %8 : vector<2x512xf32> to vector<2x512xbf16>
    %c0_6 = arith.constant 0 : index
    %c0_7 = arith.constant 0 : index
    %10 = vector.load %arg4[%c0_6, %c0_7] : memref<512x512xbf16, #tpu.memory_space<vmem>>, vector<512x512xbf16>
    %cst_8 = arith.constant dense<0.000000e+00> : vector<2x512xf32>
    %11 = tpu.matmul %9, %10, %cst_8 {dimension_numbers = #tpu.dot_dimension_numbers<[1], [0], [0], [1], [0, 0, 1, 1], [], []>} : vector<2x512xbf16>, vector<512x512xbf16>, vector<2x512xf32> -> vector<2x512xf32>
    %c0_9 = arith.constant 0 : index
    %c0_10 = arith.constant 0 : index
    %12 = vector.load %arg5[%c0_9, %c0_10] : memref<1x512xf32, #tpu.memory_space<vmem>>, vector<1x512xf32>
    %13 = vector.broadcast %12 : vector<1x512xf32> to vector<2x512xf32>
    %14 = arith.addf %11, %13 : vector<2x512xf32>
    %cst_11 = arith.constant 0.000000e+00 : f32
    %15 = vector.broadcast %cst_11 : f32 to vector<2x512xf32>
    %16 = arith.maximumf %14, %15 : vector<2x512xf32>
    %17 = arith.truncf %16 : vector<2x512xf32> to vector<2x512xbf16>
    %c0_12 = arith.constant 0 : index
    %c0_13 = arith.constant 0 : index
    %18 = vector.load %arg6[%c0_12, %c0_13] : memref<512x128xbf16, #tpu.memory_space<vmem>>, vector<512x128xbf16>
    %cst_14 = arith.constant dense<0.000000e+00> : vector<2x128xf32>
    %19 = tpu.matmul %17, %18, %cst_14 {dimension_numbers = #tpu.dot_dimension_numbers<[1], [0], [0], [1], [0, 0, 1, 1], [], []>} : vector<2x512xbf16>, vector<512x128xbf16>, vector<2x128xf32> -> vector<2x128xf32>
    %c0_15 = arith.constant 0 : index
    %c0_16 = arith.constant 0 : index
    %20 = vector.load %arg7[%c0_15, %c0_16] : memref<1x128xf32, #tpu.memory_space<vmem>>, vector<1x128xf32>
    %21 = vector.broadcast %20 : vector<1x128xf32> to vector<2x128xf32>
    %22 = arith.addf %19, %21 : vector<2x128xf32>
    %c0_17 = arith.constant 0 : index
    %c0_18 = arith.constant 0 : index
    %23 = vector.load %arg8[%c0_17, %c0_18] : memref<2x128xf32, #tpu.memory_space<vmem>>, vector<2x128xf32>
    tpu.vector_store %arg8[%c0_17, %c0_18], %22 {strides = array<i32>} : memref<2x128xf32, #tpu.memory_space<vmem>>, vector<2x128xf32>,
    return
  }
  func.func @transform_0(%arg0: i32) -> (i32, i32) {
    %c0_i32 = arith.constant 0 : i32
    %c0_i32_0 = arith.constant 0 : i32
    return %arg0, %c0_i32 : i32, i32
  }
  func.func @transform_1(%arg0: i32) -> (i32, i32) {
    %c0_i32 = arith.constant 0 : i32
    %c0_i32_0 = arith.constant 0 : i32
    %c0_i32_1 = arith.constant 0 : i32
    return %c0_i32, %c0_i32_0 : i32, i32
  }
  func.func @transform_2(%arg0: i32) -> (i32, i32) {
    %c0_i32 = arith.constant 0 : i32
    %c0_i32_0 = arith.constant 0 : i32
    %c0_i32_1 = arith.constant 0 : i32
    return %c0_i32, %c0_i32_0 : i32, i32
  }
  func.func @transform_3(%arg0: i32) -> (i32, i32) {
    %c0_i32 = arith.constant 0 : i32
    %c0_i32_0 = arith.constant 0 : i32
    %c0_i32_1 = arith.constant 0 : i32
    return %c0_i32, %c0_i32_0 : i32, i32
  }
  func.func @transform_4(%arg0: i32) -> (i32, i32) {
    %c0_i32 = arith.constant 0 : i32
    %c0_i32_0 = arith.constant 0 : i32
    %c0_i32_1 = arith.constant 0 : i32
    return %c0_i32, %c0_i32_0 : i32, i32
  }
  func.func @transform_5(%arg0: i32) -> (i32, i32) {
    %c0_i32 = arith.constant 0 : i32
    %c0_i32_0 = arith.constant 0 : i32
    %c0_i32_1 = arith.constant 0 : i32
    return %c0_i32, %c0_i32_0 : i32, i32
  }
  func.func @transform_6(%arg0: i32) -> (i32, i32) {
    %c0_i32 = arith.constant 0 : i32
    %c0_i32_0 = arith.constant 0 : i32
    %c0_i32_1 = arith.constant 0 : i32
    return %c0_i32, %c0_i32_0 : i32, i32
  }
  func.func @transform_7(%arg0: i32) -> (i32, i32) {
    %c0_i32 = arith.constant 0 : i32
    %c0_i32_0 = arith.constant 0 : i32
    return %arg0, %c0_i32 : i32, i32
  }
}

</mosaic_0001>

<bundles_post_ra>
// kernel: neural_network_forward.1
= control target key start
LH: loop header
LB: loop body
LE: loop exit
PB: predicated region body
PF: predicated region fallthrough
CT: control target
= control target key end

     0   :  { %12 = vsyncpa [#allocation3], 0  ;;  %s4222_s0 = inlined_call_operand.vmem [shape: f32[2,784], index: 0, kind: input, shape index: {}]   ;;  %s4223_s1 = inlined_call_operand.hbm [shape: bf16[784,512], index: 1, kind: input, shape index: {}]   ;;  %s4224_s2 = inlined_call_operand.vmem [shape: f32[1,512], index: 2, kind: input, shape index: {}]   ;;  %s4225_s3 = inlined_call_operand.hbm [shape: bf16[512,512], index: 3, kind: input, shape index: {}]   ;;  %s4226_s4 = inlined_call_operand.vmem [shape: f32[1,512], index: 4, kind: input, shape index: {}]   ;;  %s4227_s5 = inlined_call_operand.hbm [shape: bf16[512,128], index: 5, kind: input, shape index: {}]   ;;  %s4228_s6 = inlined_call_operand.vmem [shape: f32[1,128], index: 6, kind: input, shape index: {}]   ;;  %s4229_s7 = inlined_call_operand.hbm [shape: f32[2,128], index: 7, kind: output, shape index: {}]  }
   0x1   :  { %13 = vsyncpa [#allocation6], 0 }
   0x2   :  { %14 = vsyncpa [#allocation4], 0  ;;  %s4047_s24 = smov [#allocation5]   ;;  %s4048_s26 = smov [#allocation2]  }
   0x3   :  { %s36_s25 = sshll.u32 %s4047_s24, 4  ;;  %s22_s27 = sshll.u32 %s4048_s26, 4  ;;  %s37_s25 = int_to_ptr.vmem [resolvable:$true] %s36_s25  ;;  %s4097_s27 = int_to_ptr.vmem [resolvable:$true] %s22_s27 }
   0x4   :  { %s3953_s30 = scalar_lea.hbm %s4225_s3, 16384 }
   0x5   :  { %p3954_p0 = scmp.ne.s32.totalorder %s4225_s3, %s3953_s30  ;;  %p3957_p1 = scmp.lt.u32.totalorder %s3953_s30, %s4225_s3 }
   0x7   :  { %p3959_p2 = pnand %p3957_p1, %p3954_p0 }
   0x9   :  { %3962 = shalt.err (!%p3959_p2)
}
   0xa   :  { %s3963_s12 = scalar_lea.vmem %s37_s25, 16384  ;;  %p3968_p4 = scmp.lt.s32.totalorder %s37_s25, %s37_s25 }
   0xb   :  { %p3964_p3 = scmp.ne.s32.totalorder %s37_s25, %s3963_s12  ;;  %p3969_p5 = scmp.lt.s32.totalorder %s3963_s12, %s3963_s12 }
   0xd   :  { %p3970_p6 = por %p3969_p5, %p3968_p4 }
   0xf   :  { %p3971_p7 = pnand %p3970_p6, %p3964_p3 }
  0x11   :  { %3974 = shalt.err (!%p3971_p7)
}
  0x12   :  { %s4049_s13 = smov 256   ;;  %s4050_s14 = smov 16  }
  0x13   :  { %42 = dma.hbm_to_vmem [thread:$0]  %s4225_s3, 16384, %s37_s25, [#allocation6], %s4049_s13, %s4049_s13, %s4050_s14  }
  0x14   :  { %s3975_s19 = scalar_lea.hbm %s4223_s1, 25088 }
  0x15   :  { %p3976_p8 = scmp.ne.s32.totalorder %s4223_s1, %s3975_s19  ;;  %p3979_p9 = scmp.lt.u32.totalorder %s3975_s19, %s4223_s1 }
  0x17   :  { %p3981_p10 = pnand %p3979_p9, %p3976_p8 }
  0x19   :  { %3984 = shalt.err (!%p3981_p10)
}
  0x1a   :  { %s3985_s24 = scalar_lea.vmem %s4097_s27, 25088  ;;  %p3990_p12 = scmp.lt.s32.totalorder %s4097_s27, %s4097_s27 }
  0x1b   :  { %p3986_p11 = scmp.ne.s32.totalorder %s4097_s27, %s3985_s24  ;;  %p3991_p13 = scmp.lt.s32.totalorder %s3985_s24, %s3985_s24 }
  0x1d   :  { %p3992_p0 = por %p3991_p13, %p3990_p12 }
  0x1f   :  { %p3993_p1 = pnand %p3992_p0, %p3986_p11 }
  0x21   :  { %3996 = shalt.err (!%p3993_p1)
}
  0x22   :  { %28 = dma.hbm_to_vmem [thread:$0]  %s4223_s1, 25088, %s4097_s27, [#allocation3], %s4049_s13, %s4049_s13, %s4050_s14  }
  0x23   :  { %s4051_s26 = smov [#allocation7]   ;;  %s3997_s8 = scalar_lea.hbm %s4227_s5, 4096 }
  0x24   :  { %s50_s28 = sshll.u32 %s4051_s26, 4  ;;  %p3998_p2 = scmp.ne.s32.totalorder %s4227_s5, %s3997_s8  ;;  %s51_s28 = int_to_ptr.vmem [resolvable:$true] %s50_s28 }
  0x25   :  { %p4001_p3 = scmp.lt.u32.totalorder %s3997_s8, %s4227_s5 }
  0x27   :  { %p4003_p4 = pnand %p4001_p3, %p3998_p2 }
  0x29   :  { %4006 = shalt.err (!%p4003_p4)
}
  0x2a   :  { %s4007_s15 = scalar_lea.vmem %s51_s28, 4096  ;;  %p4012_p6 = scmp.lt.s32.totalorder %s51_s28, %s51_s28 }
  0x2b   :  { %p4008_p5 = scmp.ne.s32.totalorder %s51_s28, %s4007_s15  ;;  %p4013_p7 = scmp.lt.s32.totalorder %s4007_s15, %s4007_s15 }
  0x2d   :  { %p4014_p8 = por %p4013_p7, %p4012_p6 }
  0x2f   :  { %p4015_p9 = pnand %p4014_p8, %p4008_p5 }
  0x31   :  { %4018 = shalt.err (!%p4015_p9)
}
  0x32   :  { %s4052_s1 = smov 64   ;;  %s4053_s27 = smov 4  }
  0x33   :  { %56 = dma.hbm_to_vmem [thread:$0]  %s4227_s5, 4096, %s51_s28, [#allocation6], %s4052_s1, %s4052_s1, %s4053_s27  }
  0x34   :  { %4041 = dma.done.wait [#allocation3], 25088  }
  0x35   :  { %4042 = vsyncadd [#allocation3], 4294942208 }
  0x36   :  { %4043 = dma.done.wait [#allocation6], 20480  }
  0x37   :  { %4044 = vsyncadd [#allocation6], 4294946816  ;;  %v3433_v0 = vld [vmem:[#allocation2 + $0x4] ss:$16 sps:$4 sm:$0xff]   ;;  %v3435_v1 = vld [vmem:[#allocation2 + $0xc] ss:$16 sps:$4 sm:$0xff]   ;;  %v77_v38 = vlaneseq }
  0x38   :  { %1322 = vmatprep.subr.bf16.mxu0 %v3433_v0  ;;  %v3437_v2 = vld [vmem:[#allocation2] ss:$16 sps:$4 sm:$0xff]   ;;  %v3438_v3 = vld [vmem:[#allocation2 + $0x8] ss:$16 sps:$4 sm:$0xff]   ;;  %1486 = vmatprep.subr.bf16.mxu1 %v3435_v1  ;;  %v3439_v4 = vld [vmem:[#allocation2 + $0x24] ss:$16 sps:$4 sm:$0xff]  }
  0x39   :  { %1323 = vmatpush1.bf16.msra.mxu0 %v3437_v2  ;;  %1487 = vmatpush1.bf16.msra.mxu1 %v3438_v3  ;;  %v3441_v5 = vld [vmem:[#allocation2 + $0x2c] ss:$16 sps:$4 sm:$0xff]   ;;  %v3443_v6 = vld [vmem:[#allocation2 + $0x20] ss:$16 sps:$4 sm:$0xff]   ;;  %v3444_v7 = vld [vmem:[#allocation2 + $0x28] ss:$16 sps:$4 sm:$0xff]  }
  0x3a   :  { %1324 = vmatprep.subr.bf16.mxu0 %v3439_v4  ;;  %1488 = vmatprep.subr.bf16.mxu1 %v3441_v5  ;;  %v3445_v8 = vld [vmem:[#allocation2 + $0x44] ss:$16 sps:$4 sm:$0xff]   ;;  %v3447_v9 = vld [vmem:[#allocation2 + $0x4c] ss:$16 sps:$4 sm:$0xff]   ;;  %v3449_v10 = vld [vmem:[#allocation2 + $0x40] ss:$16 sps:$4 sm:$0xff]  }
  0x3b   :  { %v3450_v11 = vld [vmem:[#allocation2 + $0x48] ss:$16 sps:$4 sm:$0xff]   ;;  %v3451_v12 = vld [vmem:[#allocation2 + $0x64] ss:$16 sps:$4 sm:$0xff]   ;;  %v3453_v13 = vld [vmem:[#allocation2 + $0x6c] ss:$16 sps:$4 sm:$0xff]  }
  0x3c   :  { %v3455_v14 = vld [vmem:[#allocation2 + $0x60] ss:$16 sps:$4 sm:$0xff]   ;;  %v3456_v15 = vld [vmem:[#allocation2 + $0x68] ss:$16 sps:$4 sm:$0xff]   ;;  %v3457_v16 = vld [vmem:[#allocation2 + $0x84] ss:$16 sps:$4 sm:$0xff]  }
  0x3d   :  { %1325 = vmatpush1.bf16.msra.mxu0 %v3443_v6  ;;  %1489 = vmatpush1.bf16.msra.mxu1 %v3444_v7  ;;  %v3459_v17 = vld [vmem:[#allocation2 + $0x8c] ss:$16 sps:$4 sm:$0xff]   ;;  %v3461_v18 = vld [vmem:[#allocation2 + $0x80] ss:$16 sps:$4 sm:$0xff]   ;;  %v3462_v19 = vld [vmem:[#allocation2 + $0x88] ss:$16 sps:$4 sm:$0xff]  }
  0x3e   :  { %1326 = vmatprep.subr.bf16.mxu0 %v3445_v8  ;;  %1490 = vmatprep.subr.bf16.mxu1 %v3447_v9  ;;  %v3463_v20 = vld [vmem:[#allocation2 + $0xa4] ss:$16 sps:$4 sm:$0xff]   ;;  %v3465_v21 = vld [vmem:[#allocation2 + $0xac] ss:$16 sps:$4 sm:$0xff]   ;;  %v3467_v22 = vld [vmem:[#allocation2 + $0xa0] ss:$16 sps:$4 sm:$0xff]  }
  0x3f   :  { %v3468_v23 = vld [vmem:[#allocation2 + $0xa8] ss:$16 sps:$4 sm:$0xff]   ;;  %v3469_v24 = vld [vmem:[#allocation2 + $0xc4] ss:$16 sps:$4 sm:$0xff]   ;;  %v3471_v25 = vld [vmem:[#allocation2 + $0xcc] ss:$16 sps:$4 sm:$0xff]  }
  0x40   :  { %v3473_v26 = vld [vmem:[#allocation2 + $0xc0] ss:$16 sps:$4 sm:$0xff]   ;;  %v3474_v27 = vld [vmem:[#allocation2 + $0xc8] ss:$16 sps:$4 sm:$0xff]   ;;  %v3475_v28 = vld [vmem:[#allocation2 + $0xe4] ss:$16 sps:$4 sm:$0xff]  }
  0x41   :  { %1327 = vmatpush1.bf16.msra.mxu0 %v3449_v10  ;;  %1491 = vmatpush1.bf16.msra.mxu1 %v3450_v11  ;;  %v3477_v29 = vld [vmem:[#allocation2 + $0xec] ss:$16 sps:$4 sm:$0xff]   ;;  %v3479_v30 = vld [vmem:[#allocation2 + $0xe0] ss:$16 sps:$4 sm:$0xff]   ;;  %v3480_v31 = vld [vmem:[#allocation2 + $0xe8] ss:$16 sps:$4 sm:$0xff]  }
  0x42   :  { %1328 = vmatprep.subr.bf16.mxu0 %v3451_v12  ;;  %1492 = vmatprep.subr.bf16.mxu1 %v3453_v13  ;;  %v3481_v32 = vld [vmem:[#allocation2 + $0x104] ss:$16 sps:$4 sm:$0xff]   ;;  %v3483_v33 = vld [vmem:[#allocation2 + $0x10c] ss:$16 sps:$4 sm:$0xff]   ;;  %v3485_v34 = vld [vmem:[#allocation2 + $0x100] ss:$16 sps:$4 sm:$0xff]  }
  0x43   :  { %v3486_v35 = vld [vmem:[#allocation2 + $0x108] ss:$16 sps:$4 sm:$0xff]   ;;  %v4054_v36 = vmov 1983009808   ;;  %v3487_v39 = vld [vmem:[#allocation2 + $0x124] ss:$16 sps:$4 sm:$0xff]  }
  0x44   :  { %v75_v37 = vunpack.c.l.s4 %v4054_v36  ;;  %v3489_v40 = vld [vmem:[#allocation2 + $0x12c] ss:$16 sps:$4 sm:$0xff]   ;;  %v3491_v41 = vld [vmem:[#allocation2 + $0x120] ss:$16 sps:$4 sm:$0xff]   ;;  %v4140_v43 = vshrl.u32 %v77_v38, 7  ;;  %vm1318_vm0 = vcmask 130048  }
  0x45   :  { %1329 = vmatpush1.bf16.msra.mxu0 %v3455_v14  ;;  %1493 = vmatpush1.bf16.msra.mxu1 %v3456_v15  ;;  %v3492_v44 = vld [vmem:[#allocation2 + $0x128] ss:$16 sps:$4 sm:$0xff]   ;;  %v3493_v45 = vld [vmem:[#allocation2 + $0x144] ss:$16 sps:$4 sm:$0xff]   ;;  %v3495_v46 = vld [vmem:[#allocation2 + $0x14c] ss:$16 sps:$4 sm:$0xff]  }
  0x46   :  { %1330 = vmatprep.subr.bf16.mxu0 %v3457_v16  ;;  %1494 = vmatprep.subr.bf16.mxu1 %v3459_v17  ;;  %v76_v42 = vunpack.c.0.s8 %v75_v37  ;;  %v3497_v47 = vld [vmem:[#allocation2 + $0x140] ss:$16 sps:$4 sm:$0xff]   ;;  %v3498_v48 = vld [vmem:[#allocation2 + $0x148] ss:$16 sps:$4 sm:$0xff]   ;;  %v3499_v50 = vld [vmem:[#allocation2 + $0x164] ss:$16 sps:$4 sm:$0xff]  }
  0x47   :  { %v3501_v51 = vld [vmem:[#allocation2 + $0x16c] ss:$16 sps:$4 sm:$0xff]   ;;  %v69_v52 = vld [vmem:[%s4222_s0] sm:$0xff]  ;;  %v3504_v55 = vld [vmem:[#allocation2 + $0x168] ss:$16 sps:$4 sm:$0xff]   ;;  %s4056_s22 = smov [#allocation8]  }
  0x48   :  { %v4143_v49 = vsub.s32 %v76_v42, %v4140_v43  ;;  %v3503_v53 = vld [vmem:[#allocation2 + $0x160] ss:$16 sps:$4 sm:$0xff]   ;;  %v3505_v56 = vld [vmem:[#allocation2 + $0x184] ss:$16 sps:$4 sm:$0xff]   ;;  %v3507_v57 = vld [vmem:[#allocation2 + $0x18c] ss:$16 sps:$4 sm:$0xff]   ;;  %v73_v4 = vcombine.high %v69_v52, %v69_v52 }
  0x49   :  { %1331 = vmatpush1.bf16.msra.mxu0 %v3461_v18  ;;  %1495 = vmatpush1.bf16.msra.mxu1 %v3462_v19  ;;  %v3509_v59 = vld [vmem:[#allocation2 + $0x180] ss:$16 sps:$4 sm:$0xff]   ;;  %v3510_v61 = vld [vmem:[#allocation2 + $0x188] ss:$16 sps:$4 sm:$0xff]   ;;  %v3511_v62 = vld [vmem:[#allocation2 + $0x1a4] ss:$16 sps:$4 sm:$0xff]  }
  0x4a   :  { %1332 = vmatprep.subr.bf16.mxu0 %v3463_v20  ;;  %1496 = vmatprep.subr.bf16.mxu1 %v3465_v21  ;;  %v80_v54 = vrot.slane %v69_v52, %v4143_v49  ;;  %v3513_v63 = vld [vmem:[#allocation2 + $0x1ac] ss:$16 sps:$4 sm:$0xff]   ;;  %v3515_v0 = vld [vmem:[#allocation2 + $0x1a0] ss:$16 sps:$4 sm:$0xff]   ;;  %v3516_v1 = vld [vmem:[#allocation2 + $0x1a8] ss:$16 sps:$4 sm:$0xff]   ;;  %v4150_v9 = vrot.slane %v73_v4, %v4143_v49 }
  0x4b   :  { %v3517_v2 = vld [vmem:[#allocation2 + $0x1c4] ss:$16 sps:$4 sm:$0xff]   ;;  %v3519_v3 = vld [vmem:[#allocation2 + $0x1cc] ss:$16 sps:$4 sm:$0xff]   ;;  %v3521_v5 = vld [vmem:[#allocation2 + $0x1c0] ss:$16 sps:$4 sm:$0xff]  }
  0x4c   :  { %v88_v58 = vcombine.high %v80_v54, %v80_v54  ;;  %v3522_v6 = vld [vmem:[#allocation2 + $0x1c8] ss:$16 sps:$4 sm:$0xff]   ;;  %v3523_v7 = vld [vmem:[#allocation2 + $0x1e4] ss:$16 sps:$4 sm:$0xff]   ;;  %v3525_v8 = vld [vmem:[#allocation2 + $0x1ec] ss:$16 sps:$4 sm:$0xff]   ;;  %v89_v14 = vcombine.high %v4150_v9, %v4150_v9  ;;  %v113_v16 = vpack.c.bf16 %v80_v54, %v80_v54 }
  0x4d   :  { %1333 = vmatpush1.bf16.msra.mxu0 %v3467_v22  ;;  %1497 = vmatpush1.bf16.msra.mxu1 %v3468_v23  ;;  %v3527_v10 = vld [vmem:[#allocation2 + $0x1e0] ss:$16 sps:$4 sm:$0xff]   ;;  %v3528_v11 = vld [vmem:[#allocation2 + $0x1e8] ss:$16 sps:$4 sm:$0xff]   ;;  %v3532_v12 = vld [vmem:[#allocation2 + $0x204] ss:$16 sps:$4 sm:$0xff]  }
  0x4e   :  { %1334 = vmatprep.subr.bf16.mxu0 %v3469_v24  ;;  %1498 = vmatprep.subr.bf16.mxu1 %v3471_v25  ;;  %v114_v60 = vpack.c.bf16 %v88_v58, %v88_v58  ;;  %v3535_v13 = vld [vmem:[#allocation2 + $0x20c] ss:$16 sps:$4 sm:$0xff]   ;;  %v3530_v15 = vld [vmem:[#allocation2 + $0x200] ss:$16 sps:$4 sm:$0xff]   ;;  %v3533_v17 = vld [vmem:[#allocation2 + $0x208] ss:$16 sps:$4 sm:$0xff]   ;;  %v116_v20 = vpack.c.bf16 %v89_v14, %v89_v14 }
  0x4f   :  { %v3538_v18 = vld [vmem:[#allocation2 + $0x224] ss:$16 sps:$4 sm:$0xff]   ;;  %v3541_v19 = vld [vmem:[#allocation2 + $0x22c] ss:$16 sps:$4 sm:$0xff]   ;;  %v3536_v21 = vld [vmem:[#allocation2 + $0x220] ss:$16 sps:$4 sm:$0xff]  }
  0x50   :  { %1354 = vmatprep.mubr.bf16.mxu0 %v114_v60  ;;  %1518 = vmatprep.mubr.bf16.mxu1 %v114_v60  ;;  %v3539_v22 = vld [vmem:[#allocation2 + $0x228] ss:$16 sps:$4 sm:$0xff]   ;;  %v3544_v23 = vld [vmem:[#allocation2 + $0x244] ss:$16 sps:$4 sm:$0xff]   ;;  %v3547_v24 = vld [vmem:[#allocation2 + $0x24c] ss:$16 sps:$4 sm:$0xff]  }
  0x51   :  { %1335 = vmatpush1.bf16.msra.mxu0 %v3473_v26  ;;  %1499 = vmatpush1.bf16.msra.mxu1 %v3474_v27  ;;  %v3542_v25 = vld [vmem:[#allocation2 + $0x240] ss:$16 sps:$4 sm:$0xff]   ;;  %v3545_v26 = vld [vmem:[#allocation2 + $0x248] ss:$16 sps:$4 sm:$0xff]   ;;  %v3550_v27 = vld [vmem:[#allocation2 + $0x264] ss:$16 sps:$4 sm:$0xff]  }
  0x52   :  { %1336 = vmatprep.subr.bf16.mxu0 %v3475_v28  ;;  %1500 = vmatprep.subr.bf16.mxu1 %v3477_v29  ;;  %v3553_v28 = vld [vmem:[#allocation2 + $0x26c] ss:$16 sps:$4 sm:$0xff]   ;;  %v3548_v29 = vld [vmem:[#allocation2 + $0x260] ss:$16 sps:$4 sm:$0xff]   ;;  %v3563_v38 = vld [vmem:[#allocation2 + $0x2a8] ss:$16 sps:$4 sm:$0xff]  }
  0x53   :  { %v3565_v36 = vld [vmem:[#allocation2 + $0x2ac] ss:$16 sps:$4 sm:$0xff]   ;;  %v3560_v37 = vld [vmem:[#allocation2 + $0x2a0] ss:$16 sps:$4 sm:$0xff]   ;;  %v3569_v42 = vld [vmem:[#allocation2 + $0x2c8] ss:$16 sps:$4 sm:$0xff]  }
  0x54   :  { %v3581_v52 = vld [vmem:[#allocation2 + $0x308] ss:$16 sps:$4 sm:$0xff]   ;;  %v3589_v54 = vld [vmem:[#allocation2 + $0x32c] ss:$16 sps:$4 sm:$0xff]   ;;  %v3622_v14 = vld [vmem:[#allocation2 + $0x3e4] ss:$16 sps:$4 sm:$0xff]  }
  0x55   :  { %1337 = vmatpush1.bf16.msra.mxu0 %v3479_v30  ;;  %1501 = vmatpush1.bf16.msra.mxu1 %v3480_v31  ;;  %v3551_v30 = vld [vmem:[#allocation2 + $0x268] ss:$16 sps:$4 sm:$0xff]   ;;  %v3556_v31 = vld [vmem:[#allocation2 + $0x284] ss:$16 sps:$4 sm:$0xff]   ;;  %v3595_v58 = vld [vmem:[#allocation2 + $0x34c] ss:$16 sps:$4 sm:$0xff]  }
  0x56   :  { %1338 = vmatprep.subr.bf16.mxu0 %v3481_v32  ;;  %1502 = vmatprep.subr.bf16.mxu1 %v3483_v33  ;;  %v3559_v32 = vld [vmem:[#allocation2 + $0x28c] ss:$16 sps:$4 sm:$0xff]   ;;  %v3554_v33 = vld [vmem:[#allocation2 + $0x280] ss:$16 sps:$4 sm:$0xff]   ;;  %v3593_v60 = vld [vmem:[#allocation2 + $0x348] ss:$16 sps:$4 sm:$0xff]  }
  0x57   :  { %v3605_v4 = vld [vmem:[#allocation2 + $0x388] ss:$16 sps:$4 sm:$0xff]   ;;  %s2970_s23 = sshll.u32 %s4056_s22, 4  ;;  %s2971_s23 = int_to_ptr.vmem [resolvable:$true] %s2970_s23 }
  0x58   :  { %s4019_s24 = scalar_lea.vmem %s2971_s23, 32  ;;  %p4024_p11 = scmp.lt.s32.totalorder %s2971_s23, %s2971_s23 }
  0x59   :  { %1339 = vmatpush1.bf16.msra.mxu0 %v3485_v34  ;;  %1503 = vmatpush1.bf16.msra.mxu1 %v3486_v35  ;;  %v3557_v34 = vld [vmem:[#allocation2 + $0x288] ss:$16 sps:$4 sm:$0xff]   ;;  %v3562_v35 = vld [vmem:[#allocation2 + $0x2a4] ss:$16 sps:$4 sm:$0xff]   ;;  %p4020_p10 = scmp.ne.s32.totalorder %s2971_s23, %s4019_s24  ;;  %p4025_p12 = scmp.lt.s32.totalorder %s4019_s24, %s4019_s24 }
  0x5a   :  { %1340 = vmatprep.subr.bf16.mxu0 %v3487_v39  ;;  %1504 = vmatprep.subr.bf16.mxu1 %v3489_v40  ;;  %v3568_v39 = vld [vmem:[#allocation2 + $0x2c4] ss:$16 sps:$4 sm:$0xff]   ;;  %v3571_v40 = vld [vmem:[#allocation2 + $0x2cc] ss:$16 sps:$4 sm:$0xff]  }
  0x5b   :  { %p4026_p13 = por %p4025_p12, %p4024_p11 }
  0x5d   :  { %1341 = vmatpush1.bf16.msra.mxu0 %v3491_v41  ;;  %1505 = vmatpush1.bf16.msra.mxu1 %v3492_v44  ;;  %v3566_v41 = vld [vmem:[#allocation2 + $0x2c0] ss:$16 sps:$4 sm:$0xff]   ;;  %v3574_v44 = vld [vmem:[#allocation2 + $0x2e4] ss:$16 sps:$4 sm:$0xff]   ;;  %p4027_p0 = pnand %p4026_p13, %p4020_p10 }
  0x5e   :  { %1342 = vmatprep.subr.bf16.mxu0 %v3493_v45  ;;  %1506 = vmatprep.subr.bf16.mxu1 %v3495_v46  ;;  %v3577_v45 = vld [vmem:[#allocation2 + $0x2ec] ss:$16 sps:$4 sm:$0xff]   ;;  %v3572_v46 = vld [vmem:[#allocation2 + $0x2e0] ss:$16 sps:$4 sm:$0xff]  }
  0x61   :  { %1343 = vmatpush1.bf16.msra.mxu0 %v3497_v47  ;;  %1507 = vmatpush1.bf16.msra.mxu1 %v3498_v48  ;;  %v3575_v47 = vld [vmem:[#allocation2 + $0x2e8] ss:$16 sps:$4 sm:$0xff]   ;;  %v3580_v48 = vld [vmem:[#allocation2 + $0x304] ss:$16 sps:$4 sm:$0xff]  }
  0x62   :  { %1344 = vmatprep.subr.bf16.mxu0 %v3499_v50  ;;  %1508 = vmatprep.subr.bf16.mxu1 %v3501_v51  ;;  %v3583_v50 = vld [vmem:[#allocation2 + $0x30c] ss:$16 sps:$4 sm:$0xff]   ;;  %v3578_v51 = vld [vmem:[#allocation2 + $0x300] ss:$16 sps:$4 sm:$0xff]  }
  0x65   :  { %1345 = vmatpush1.bf16.msra.mxu0 %v3503_v53  ;;  %1509 = vmatpush1.bf16.msra.mxu1 %v3504_v55  ;;  %v3586_v53 = vld [vmem:[#allocation2 + $0x324] ss:$16 sps:$4 sm:$0xff]   ;;  %v3584_v55 = vld [vmem:[#allocation2 + $0x320] ss:$16 sps:$4 sm:$0xff]  }
  0x66   :  { %1346 = vmatprep.subr.bf16.mxu0 %v3505_v56  ;;  %1510 = vmatprep.subr.bf16.mxu1 %v3507_v57  ;;  %v3587_v56 = vld [vmem:[#allocation2 + $0x328] ss:$16 sps:$4 sm:$0xff]   ;;  %v3592_v57 = vld [vmem:[#allocation2 + $0x344] ss:$16 sps:$4 sm:$0xff]  }
  0x69   :  { %1347 = vmatpush1.bf16.msra.mxu0 %v3509_v59  ;;  %1511 = vmatpush1.bf16.msra.mxu1 %v3510_v61  ;;  %v3590_v59 = vld [vmem:[#allocation2 + $0x340] ss:$16 sps:$4 sm:$0xff]   ;;  %v3598_v61 = vld [vmem:[#allocation2 + $0x364] ss:$16 sps:$4 sm:$0xff]  }
  0x6a   :  { %1348 = vmatprep.subr.bf16.mxu0 %v3511_v62  ;;  %1512 = vmatprep.subr.bf16.mxu1 %v3513_v63  ;;  %v3601_v62 = vld [vmem:[#allocation2 + $0x36c] ss:$16 sps:$4 sm:$0xff]   ;;  %v3596_v63 = vld [vmem:[#allocation2 + $0x360] ss:$16 sps:$4 sm:$0xff]  }
  0x6d   :  { %1349 = vmatpush1.bf16.msra.mxu0 %v3515_v0  ;;  %1513 = vmatpush1.bf16.msra.mxu1 %v3516_v1  ;;  %v3599_v0 = vld [vmem:[#allocation2 + $0x368] ss:$16 sps:$4 sm:$0xff]   ;;  %v3604_v1 = vld [vmem:[#allocation2 + $0x384] ss:$16 sps:$4 sm:$0xff]  }
  0x6e   :  { %1350 = vmatprep.subr.bf16.mxu0 %v3517_v2  ;;  %1514 = vmatprep.subr.bf16.mxu1 %v3519_v3  ;;  %v3607_v2 = vld [vmem:[#allocation2 + $0x38c] ss:$16 sps:$4 sm:$0xff]   ;;  %v3602_v3 = vld [vmem:[#allocation2 + $0x380] ss:$16 sps:$4 sm:$0xff]  }
  0x71   :  { %1351 = vmatpush1.bf16.msra.mxu0 %v3521_v5  ;;  %1515 = vmatpush1.bf16.msra.mxu1 %v3522_v6  ;;  %v3610_v5 = vld [vmem:[#allocation2 + $0x3a4] ss:$16 sps:$4 sm:$0xff]   ;;  %v3613_v6 = vld [vmem:[#allocation2 + $0x3ac] ss:$16 sps:$4 sm:$0xff]  }
  0x72   :  { %1352 = vmatprep.subr.bf16.mxu0 %v3523_v7  ;;  %1516 = vmatprep.subr.bf16.mxu1 %v3525_v8  ;;  %v3608_v7 = vld [vmem:[#allocation2 + $0x3a0] ss:$16 sps:$4 sm:$0xff]   ;;  %v3611_v8 = vld [vmem:[#allocation2 + $0x3a8] ss:$16 sps:$4 sm:$0xff]  }
  0x75   :  { %1353 = vmatpush1.bf16.msra.mxu0 %v3527_v10  ;;  %1517 = vmatpush1.bf16.msra.mxu1 %v3528_v11  ;;  %v3616_v10 = vld [vmem:[#allocation2 + $0x3c4] ss:$16 sps:$4 sm:$0xff]   ;;  %v3619_v11 = vld [vmem:[#allocation2 + $0x3cc] ss:$16 sps:$4 sm:$0xff]  }
  0x76   :  { %1363 = vmatprep.subr.bf16.mxu0 %v3532_v12  ;;  %1527 = vmatprep.subr.bf16.mxu1 %v3535_v13  ;;  %v3614_v12 = vld [vmem:[#allocation2 + $0x3c0] ss:$16 sps:$4 sm:$0xff]   ;;  %v3617_v13 = vld [vmem:[#allocation2 + $0x3c8] ss:$16 sps:$4 sm:$0xff]  }
  0x78   :  { %1355 = vmatmul.mubr.bf16.vlgmr.msra.gmra.mrb[0].mxu0 %v113_v16  ;;  %1519 = vmatmul.mubr.bf16.vlgmr.msra.gmra.mrb[0].mxu1 %v113_v16  ;;  %v3620_v16 = vld [vmem:[#allocation2 + $0x3e0] ss:$16 sps:$4 sm:$0xff]  }
  0x79   :  { %1364 = vmatpush1.bf16.msra.mxu0 %v3530_v15  ;;  %1528 = vmatpush1.bf16.msra.mxu1 %v3533_v17  ;;  %v3625_v15 = vld [vmem:[#allocation2 + $0x3ec] ss:$16 sps:$4 sm:$0xff]   ;;  %v3623_v17 = vld [vmem:[#allocation2 + $0x3e8] ss:$16 sps:$4 sm:$0xff]  }
  0x7a   :  { %1365 = vmatprep.subr.bf16.mxu0 %v3538_v18  ;;  %1529 = vmatprep.subr.bf16.mxu1 %v3541_v19  ;;  %v3628_v18 = vld [vmem:[#allocation2 + $0x404] ss:$16 sps:$4 sm:$0xff]   ;;  %v3631_v19 = vld [vmem:[#allocation2 + $0x40c] ss:$16 sps:$4 sm:$0xff]  }
  0x7b   :  { %1395 = vmatprep.mubr.bf16.mxu0 %v116_v20  ;;  %1559 = vmatprep.mubr.bf16.mxu1 %v116_v20  ;;  %v3626_v20 = vld [vmem:[#allocation2 + $0x400] ss:$16 sps:$4 sm:$0xff]  }
  0x7d   :  { %1366 = vmatpush1.bf16.msra.mxu0 %v3536_v21  ;;  %1530 = vmatpush1.bf16.msra.mxu1 %v3539_v22  ;;  %v115_v21 = vpack.c.bf16 %v4150_v9, %v4150_v9  ;;  %v3629_v22 = vld [vmem:[#allocation2 + $0x408] ss:$16 sps:$4 sm:$0xff]  }
  0x7e   :  { %1367 = vmatprep.subr.bf16.mxu0 %v3544_v23  ;;  %1531 = vmatprep.subr.bf16.mxu1 %v3547_v24  ;;  %v4159_v23 = vld [vmem:[%s4222_s0 + $0x8] sm:$0x3f]  ;;  %v3634_v24 = vld [vmem:[#allocation2 + $0x424] ss:$16 sps:$4 sm:$0xff]  }
  0x81   :  { %1368 = vmatpush1.bf16.msra.mxu0 %v3542_v25  ;;  %1532 = vmatpush1.bf16.msra.mxu1 %v3545_v26  ;;  %v3637_v25 = vld [vmem:[#allocation2 + $0x42c] ss:$16 sps:$4 sm:$0xff]   ;;  %v4163_v26 = vrot.slane %v4159_v23, %v4143_v49 }
  0x82   :  { %1369 = vmatprep.subr.bf16.mxu0 %v3550_v27  ;;  %1533 = vmatprep.subr.bf16.mxu1 %v3553_v28  ;;  %v3632_v27 = vld [vmem:[#allocation2 + $0x420] ss:$16 sps:$4 sm:$0xff]   ;;  %v3635_v28 = vld [vmem:[#allocation2 + $0x428] ss:$16 sps:$4 sm:$0xff]  }
  0x83   :  { %v105_v9 = vcombine.high %v4163_v26, %v4163_v26 }
  0x85   :  { %1370 = vmatpush1.bf16.msra.mxu0 %v3548_v29  ;;  %1534 = vmatpush1.bf16.msra.mxu1 %v3551_v30  ;;  %v3640_v29 = vld [vmem:[#allocation2 + $0x444] ss:$16 sps:$4 sm:$0xff]   ;;  %v3643_v30 = vld [vmem:[#allocation2 + $0x44c] ss:$16 sps:$4 sm:$0xff]  }
  0x86   :  { %1371 = vmatprep.subr.bf16.mxu0 %v3556_v31  ;;  %1535 = vmatprep.subr.bf16.mxu1 %v3559_v32  ;;  %v118_v31 = vpack.c.bf16 %v105_v9, %v105_v9  ;;  %v3638_v32 = vld [vmem:[#allocation2 + $0x440] ss:$16 sps:$4 sm:$0xff]   ;;  %v3725_v9 = vld [vmem:[#allocation2 + $0x604] ss:$16 sps:$4 sm:$0xff]  }
  0x89   :  { %1372 = vmatpush1.bf16.msra.mxu0 %v3554_v33  ;;  %1536 = vmatpush1.bf16.msra.mxu1 %v3557_v34  ;;  %v3641_v33 = vld [vmem:[#allocation2 + $0x448] ss:$16 sps:$4 sm:$0xff]   ;;  %v3646_v34 = vld [vmem:[#allocation2 + $0x464] ss:$16 sps:$4 sm:$0xff]  }
  0x8a   :  { %1373 = vmatprep.subr.bf16.mxu0 %v3562_v35  ;;  %1537 = vmatprep.subr.bf16.mxu1 %v3565_v36  ;;  %v3649_v35 = vld [vmem:[#allocation2 + $0x46c] ss:$16 sps:$4 sm:$0xff]   ;;  %v3644_v36 = vld [vmem:[#allocation2 + $0x460] ss:$16 sps:$4 sm:$0xff]  }
  0x8d   :  { %1374 = vmatpush1.bf16.msra.mxu0 %v3560_v37  ;;  %1538 = vmatpush1.bf16.msra.mxu1 %v3563_v38  ;;  %v3647_v37 = vld [vmem:[#allocation2 + $0x468] ss:$16 sps:$4 sm:$0xff]   ;;  %v3652_v38 = vld [vmem:[#allocation2 + $0x484] ss:$16 sps:$4 sm:$0xff]  }
  0x8e   :  { %1375 = vmatprep.subr.bf16.mxu0 %v3568_v39  ;;  %1539 = vmatprep.subr.bf16.mxu1 %v3571_v40  ;;  %v3655_v39 = vld [vmem:[#allocation2 + $0x48c] ss:$16 sps:$4 sm:$0xff]   ;;  %v3650_v40 = vld [vmem:[#allocation2 + $0x480] ss:$16 sps:$4 sm:$0xff]  }
  0x91   :  { %1376 = vmatpush1.bf16.msra.mxu0 %v3566_v41  ;;  %1540 = vmatpush1.bf16.msra.mxu1 %v3569_v42  ;;  %v3653_v41 = vld [vmem:[#allocation2 + $0x488] ss:$16 sps:$4 sm:$0xff]   ;;  %v3658_v42 = vld [vmem:[#allocation2 + $0x4a4] ss:$16 sps:$4 sm:$0xff]  }
  0x92   :  { %1377 = vmatprep.subr.bf16.mxu0 %v3574_v44  ;;  %1541 = vmatprep.subr.bf16.mxu1 %v3577_v45  ;;  %v3661_v44 = vld [vmem:[#allocation2 + $0x4ac] ss:$16 sps:$4 sm:$0xff]   ;;  %v3656_v45 = vld [vmem:[#allocation2 + $0x4a0] ss:$16 sps:$4 sm:$0xff]  }
  0x95   :  { %1378 = vmatpush1.bf16.msra.mxu0 %v3572_v46  ;;  %1542 = vmatpush1.bf16.msra.mxu1 %v3575_v47  ;;  %v3659_v46 = vld [vmem:[#allocation2 + $0x4a8] ss:$16 sps:$4 sm:$0xff]   ;;  %v3664_v47 = vld [vmem:[#allocation2 + $0x4c4] ss:$16 sps:$4 sm:$0xff]  }
  0x96   :  { %1379 = vmatprep.subr.bf16.mxu0 %v3580_v48  ;;  %1543 = vmatprep.subr.bf16.mxu1 %v3583_v50  ;;  %v3667_v48 = vld [vmem:[#allocation2 + $0x4cc] ss:$16 sps:$4 sm:$0xff]   ;;  %v3662_v50 = vld [vmem:[#allocation2 + $0x4c0] ss:$16 sps:$4 sm:$0xff]  }
  0x99   :  { %1380 = vmatpush1.bf16.msra.mxu0 %v3578_v51  ;;  %1544 = vmatpush1.bf16.msra.mxu1 %v3581_v52  ;;  %v3665_v51 = vld [vmem:[#allocation2 + $0x4c8] ss:$16 sps:$4 sm:$0xff]   ;;  %v3670_v52 = vld [vmem:[#allocation2 + $0x4e4] ss:$16 sps:$4 sm:$0xff]  }
  0x9a   :  { %1381 = vmatprep.subr.bf16.mxu0 %v3586_v53  ;;  %1545 = vmatprep.subr.bf16.mxu1 %v3589_v54  ;;  %v3673_v53 = vld [vmem:[#allocation2 + $0x4ec] ss:$16 sps:$4 sm:$0xff]   ;;  %v3668_v54 = vld [vmem:[#allocation2 + $0x4e0] ss:$16 sps:$4 sm:$0xff]  }
  0x9d   :  { %1382 = vmatpush1.bf16.msra.mxu0 %v3584_v55  ;;  %1546 = vmatpush1.bf16.msra.mxu1 %v3587_v56  ;;  %v3671_v55 = vld [vmem:[#allocation2 + $0x4e8] ss:$16 sps:$4 sm:$0xff]   ;;  %v3676_v56 = vld [vmem:[#allocation2 + $0x504] ss:$16 sps:$4 sm:$0xff]  }
  0x9e   :  { %1383 = vmatprep.subr.bf16.mxu0 %v3592_v57  ;;  %1547 = vmatprep.subr.bf16.mxu1 %v3595_v58  ;;  %v3679_v57 = vld [vmem:[#allocation2 + $0x50c] ss:$16 sps:$4 sm:$0xff]   ;;  %v3674_v58 = vld [vmem:[#allocation2 + $0x500] ss:$16 sps:$4 sm:$0xff]  }
  0xa1   :  { %1384 = vmatpush1.bf16.msra.mxu0 %v3590_v59  ;;  %1548 = vmatpush1.bf16.msra.mxu1 %v3593_v60  ;;  %v3677_v59 = vld [vmem:[#allocation2 + $0x508] ss:$16 sps:$4 sm:$0xff]   ;;  %v3682_v60 = vld [vmem:[#allocation2 + $0x524] ss:$16 sps:$4 sm:$0xff]  }
  0xa2   :  { %1385 = vmatprep.subr.bf16.mxu0 %v3598_v61  ;;  %1549 = vmatprep.subr.bf16.mxu1 %v3601_v62  ;;  %v3685_v61 = vld [vmem:[#allocation2 + $0x52c] ss:$16 sps:$4 sm:$0xff]   ;;  %v3680_v62 = vld [vmem:[#allocation2 + $0x520] ss:$16 sps:$4 sm:$0xff]  }
  0xa5   :  { %1386 = vmatpush1.bf16.msra.mxu0 %v3596_v63  ;;  %1550 = vmatpush1.bf16.msra.mxu1 %v3599_v0  ;;  %v3683_v63 = vld [vmem:[#allocation2 + $0x528] ss:$16 sps:$4 sm:$0xff]   ;;  %v3688_v0 = vld [vmem:[#allocation2 + $0x544] ss:$16 sps:$4 sm:$0xff]  }
  0xa6   :  { %1387 = vmatprep.subr.bf16.mxu0 %v3604_v1  ;;  %1551 = vmatprep.subr.bf16.mxu1 %v3607_v2  ;;  %v3691_v1 = vld [vmem:[#allocation2 + $0x54c] ss:$16 sps:$4 sm:$0xff]   ;;  %v3686_v2 = vld [vmem:[#allocation2 + $0x540] ss:$16 sps:$4 sm:$0xff]  }
  0xa9   :  { %1388 = vmatpush1.bf16.msra.mxu0 %v3602_v3  ;;  %1552 = vmatpush1.bf16.msra.mxu1 %v3605_v4  ;;  %v3689_v3 = vld [vmem:[#allocation2 + $0x548] ss:$16 sps:$4 sm:$0xff]   ;;  %v3694_v4 = vld [vmem:[#allocation2 + $0x564] ss:$16 sps:$4 sm:$0xff]  }
  0xaa   :  { %1389 = vmatprep.subr.bf16.mxu0 %v3610_v5  ;;  %1553 = vmatprep.subr.bf16.mxu1 %v3613_v6  ;;  %v3697_v5 = vld [vmem:[#allocation2 + $0x56c] ss:$16 sps:$4 sm:$0xff]   ;;  %v3692_v6 = vld [vmem:[#allocation2 + $0x560] ss:$16 sps:$4 sm:$0xff]  }
  0xad   :  { %1390 = vmatpush1.bf16.msra.mxu0 %v3608_v7  ;;  %1554 = vmatpush1.bf16.msra.mxu1 %v3611_v8  ;;  %v3695_v7 = vld [vmem:[#allocation2 + $0x568] ss:$16 sps:$4 sm:$0xff]   ;;  %v3700_v8 = vld [vmem:[#allocation2 + $0x584] ss:$16 sps:$4 sm:$0xff]  }
  0xae   :  { %1391 = vmatprep.subr.bf16.mxu0 %v3616_v10  ;;  %1555 = vmatprep.subr.bf16.mxu1 %v3619_v11  ;;  %v3703_v10 = vld [vmem:[#allocation2 + $0x58c] ss:$16 sps:$4 sm:$0xff]   ;;  %v3698_v11 = vld [vmem:[#allocation2 + $0x580] ss:$16 sps:$4 sm:$0xff]  }
  0xb1   :  { %1392 = vmatpush1.bf16.msra.mxu0 %v3614_v12  ;;  %1556 = vmatpush1.bf16.msra.mxu1 %v3617_v13  ;;  %v3701_v12 = vld [vmem:[#allocation2 + $0x588] ss:$16 sps:$4 sm:$0xff]   ;;  %v3706_v13 = vld [vmem:[#allocation2 + $0x5a4] ss:$16 sps:$4 sm:$0xff]  }
  0xb2   :  { %1393 = vmatprep.subr.bf16.mxu0 %v3622_v14  ;;  %1557 = vmatprep.subr.bf16.mxu1 %v3625_v15  ;;  %v3709_v14 = vld [vmem:[#allocation2 + $0x5ac] ss:$16 sps:$4 sm:$0xff]   ;;  %v3704_v15 = vld [vmem:[#allocation2 + $0x5a0] ss:$16 sps:$4 sm:$0xff]  }
  0xb5   :  { %1394 = vmatpush1.bf16.msra.mxu0 %v3620_v16  ;;  %1558 = vmatpush1.bf16.msra.mxu1 %v3623_v17  ;;  %v3707_v16 = vld [vmem:[#allocation2 + $0x5a8] ss:$16 sps:$4 sm:$0xff]   ;;  %v3712_v17 = vld [vmem:[#allocation2 + $0x5c4] ss:$16 sps:$4 sm:$0xff]  }
  0xb6   :  { %1404 = vmatprep.subr.bf16.mxu0 %v3628_v18  ;;  %1568 = vmatprep.subr.bf16.mxu1 %v3631_v19  ;;  %v3715_v18 = vld [vmem:[#allocation2 + $0x5cc] ss:$16 sps:$4 sm:$0xff]   ;;  %v3710_v19 = vld [vmem:[#allocation2 + $0x5c0] ss:$16 sps:$4 sm:$0xff]  }
  0xb8   :  { %1396 = vmatmul.mubr.bf16.vlgmr.msra.gmra.mrb[0].mxu0 %v115_v21  ;;  %1560 = vmatmul.mubr.bf16.vlgmr.msra.gmra.mrb[0].mxu1 %v115_v21  ;;  %v3718_v21 = vld [vmem:[#allocation2 + $0x5e4] ss:$16 sps:$4 sm:$0xff]  }
  0xb9   :  { %1405 = vmatpush1.bf16.msra.mxu0 %v3626_v20  ;;  %1569 = vmatpush1.bf16.msra.mxu1 %v3629_v22  ;;  %v3713_v20 = vld [vmem:[#allocation2 + $0x5c8] ss:$16 sps:$4 sm:$0xff]   ;;  %v3721_v22 = vld [vmem:[#allocation2 + $0x5ec] ss:$16 sps:$4 sm:$0xff]  }
  0xba   :  { %1406 = vmatprep.subr.bf16.mxu0 %v3634_v24  ;;  %1570 = vmatprep.subr.bf16.mxu1 %v3637_v25  ;;  %v3716_v24 = vld [vmem:[#allocation2 + $0x5e0] ss:$16 sps:$4 sm:$0xff]   ;;  %v3719_v25 = vld [vmem:[#allocation2 + $0x5e8] ss:$16 sps:$4 sm:$0xff]  }
  0xbb   :  { %1436 = vmatprep.mubr.bf16.mxu0 %v118_v31  ;;  %1600 = vmatprep.mubr.bf16.mxu1 %v118_v31  ;;  %v3731_v31 = vld [vmem:[#allocation5 + $0x4] ss:$16 sps:$4 sm:$0xff]  }
  0xbd   :  { %1407 = vmatpush1.bf16.msra.mxu0 %v3632_v27  ;;  %1571 = vmatpush1.bf16.msra.mxu1 %v3635_v28  ;;  %v3728_v27 = vld [vmem:[#allocation2 + $0x60c] ss:$16 sps:$4 sm:$0xff]   ;;  %v3723_v28 = vld [vmem:[#allocation2 + $0x600] ss:$16 sps:$4 sm:$0xff]  }
  0xbe   :  { %1408 = vmatprep.subr.bf16.mxu0 %v3640_v29  ;;  %1572 = vmatprep.subr.bf16.mxu1 %v3643_v30  ;;  %v3726_v29 = vld [vmem:[#allocation2 + $0x608] ss:$16 sps:$4 sm:$0xff]   ;;  %v117_v30 = vpack.c.bf16 %v4163_v26, %v4163_v26 }
  0xc1   :  { %1409 = vmatpush1.bf16.msra.mxu0 %v3638_v32  ;;  %1573 = vmatpush1.bf16.msra.mxu1 %v3641_v33  ;;  %v3734_v32 = vld [vmem:[#allocation5 + $0xc] ss:$16 sps:$4 sm:$0xff]   ;;  %v90_v33 = vcombine.high %v4159_v23, %v4159_v23  ;;  %v3743_v23 = vld [vmem:[#allocation5 + $0x44] ss:$16 sps:$4 sm:$0xff]  }
  0xc2   :  { %1410 = vmatprep.subr.bf16.mxu0 %v3646_v34  ;;  %1574 = vmatprep.subr.bf16.mxu1 %v3649_v35  ;;  %v4055_v34 = vmov 0   ;;  %v3729_v35 = vld [vmem:[#allocation5] ss:$16 sps:$4 sm:$0xff]  }
  0xc3   :  { %v104_v26 = vrot.slane %v90_v33, %v4143_v49  ;;  %v3747_v49 = vld [vmem:[#allocation5 + $0x60] ss:$16 sps:$4 sm:$0xff]   ;;  %v3824_v33 = vld [vmem:[#allocation5 + $0x1ec] ss:$16 sps:$4 sm:$0xff]  }
  0xc5   :  { %1411 = vmatpush1.bf16.msra.mxu0 %v3644_v36  ;;  %1575 = vmatpush1.bf16.msra.mxu1 %v3647_v37  ;;  %v3732_v36 = vld [vmem:[#allocation5 + $0x8] ss:$16 sps:$4 sm:$0xff]   ;;  %v119_v37 = vpack.c.bf16 %v104_v26, %v104_v26 }
  0xc6   :  { %1412 = vmatprep.subr.bf16.mxu0 %v3652_v38  ;;  %1576 = vmatprep.subr.bf16.mxu1 %v3655_v39  ;;  %v3737_v38 = vld [vmem:[#allocation5 + $0x24] ss:$16 sps:$4 sm:$0xff]   ;;  %v3740_v39 = vld [vmem:[#allocation5 + $0x2c] ss:$16 sps:$4 sm:$0xff]   ;;  %v3822_v26 = vld [vmem:[#allocation5 + $0x1e8] ss:$16 sps:$4 sm:$0xff]  }
  0xc9   :  { %1413 = vmatpush1.bf16.msra.mxu0 %v3650_v40  ;;  %1577 = vmatpush1.bf16.msra.mxu1 %v3653_v41  ;;  %v3735_v40 = vld [vmem:[#allocation5 + $0x20] ss:$16 sps:$4 sm:$0xff]   ;;  %v3738_v41 = vld [vmem:[#allocation5 + $0x28] ss:$16 sps:$4 sm:$0xff]  }
  0xca   :  { %1414 = vmatprep.subr.bf16.mxu0 %v3658_v42  ;;  %1578 = vmatprep.subr.bf16.mxu1 %v3661_v44  ;;  %v3746_v42 = vld [vmem:[#allocation5 + $0x4c] ss:$16 sps:$4 sm:$0xff]   ;;  %v3741_v44 = vld [vmem:[#allocation5 + $0x40] ss:$16 sps:$4 sm:$0xff]  }
  0xcd   :  { %1415 = vmatpush1.bf16.msra.mxu0 %v3656_v45  ;;  %1579 = vmatpush1.bf16.msra.mxu1 %v3659_v46  ;;  %v3744_v45 = vld [vmem:[#allocation5 + $0x48] ss:$16 sps:$4 sm:$0xff]   ;;  %v3749_v46 = vld [vmem:[#allocation5 + $0x64] ss:$16 sps:$4 sm:$0xff]  }
  0xce   :  { %1416 = vmatprep.subr.bf16.mxu0 %v3664_v47  ;;  %1580 = vmatprep.subr.bf16.mxu1 %v3667_v48  ;;  %v3752_v47 = vld [vmem:[#allocation5 + $0x6c] ss:$16 sps:$4 sm:$0xff]   ;;  %v3750_v48 = vld [vmem:[#allocation5 + $0x68] ss:$16 sps:$4 sm:$0xff]  }
  0xd1   :  { %1417 = vmatpush1.bf16.msra.mxu0 %v3662_v50  ;;  %1581 = vmatpush1.bf16.msra.mxu1 %v3665_v51  ;;  %v3755_v50 = vld [vmem:[#allocation5 + $0x84] ss:$16 sps:$4 sm:$0xff]   ;;  %v3758_v51 = vld [vmem:[#allocation5 + $0x8c] ss:$16 sps:$4 sm:$0xff]  }
  0xd2   :  { %1418 = vmatprep.subr.bf16.mxu0 %v3670_v52  ;;  %1582 = vmatprep.subr.bf16.mxu1 %v3673_v53  ;;  %v3753_v52 = vld [vmem:[#allocation5 + $0x80] ss:$16 sps:$4 sm:$0xff]   ;;  %v3756_v53 = vld [vmem:[#allocation5 + $0x88] ss:$16 sps:$4 sm:$0xff]  }
  0xd5   :  { %1419 = vmatpush1.bf16.msra.mxu0 %v3668_v54  ;;  %1583 = vmatpush1.bf16.msra.mxu1 %v3671_v55  ;;  %v3761_v54 = vld [vmem:[#allocation5 + $0xa4] ss:$16 sps:$4 sm:$0xff]   ;;  %v3764_v55 = vld [vmem:[#allocation5 + $0xac] ss:$16 sps:$4 sm:$0xff]  }
  0xd6   :  { %1420 = vmatprep.subr.bf16.mxu0 %v3676_v56  ;;  %1584 = vmatprep.subr.bf16.mxu1 %v3679_v57  ;;  %v3759_v56 = vld [vmem:[#allocation5 + $0xa0] ss:$16 sps:$4 sm:$0xff]   ;;  %v3762_v57 = vld [vmem:[#allocation5 + $0xa8] ss:$16 sps:$4 sm:$0xff]  }
  0xd9   :  { %1421 = vmatpush1.bf16.msra.mxu0 %v3674_v58  ;;  %1585 = vmatpush1.bf16.msra.mxu1 %v3677_v59  ;;  %v3767_v58 = vld [vmem:[#allocation5 + $0xc4] ss:$16 sps:$4 sm:$0xff]   ;;  %v3770_v59 = vld [vmem:[#allocation5 + $0xcc] ss:$16 sps:$4 sm:$0xff]  }
  0xda   :  { %1422 = vmatprep.subr.bf16.mxu0 %v3682_v60  ;;  %1586 = vmatprep.subr.bf16.mxu1 %v3685_v61  ;;  %v3765_v60 = vld [vmem:[#allocation5 + $0xc0] ss:$16 sps:$4 sm:$0xff]   ;;  %v3768_v61 = vld [vmem:[#allocation5 + $0xc8] ss:$16 sps:$4 sm:$0xff]  }
  0xdd   :  { %1423 = vmatpush1.bf16.msra.mxu0 %v3680_v62  ;;  %1587 = vmatpush1.bf16.msra.mxu1 %v3683_v63  ;;  %v3773_v62 = vld [vmem:[#allocation5 + $0xe4] ss:$16 sps:$4 sm:$0xff]   ;;  %v3776_v63 = vld [vmem:[#allocation5 + $0xec] ss:$16 sps:$4 sm:$0xff]  }
  0xde   :  { %1424 = vmatprep.subr.bf16.mxu0 %v3688_v0  ;;  %1588 = vmatprep.subr.bf16.mxu1 %v3691_v1  ;;  %v3771_v0 = vld [vmem:[#allocation5 + $0xe0] ss:$16 sps:$4 sm:$0xff]   ;;  %v3774_v1 = vld [vmem:[#allocation5 + $0xe8] ss:$16 sps:$4 sm:$0xff]  }
  0xe1   :  { %1425 = vmatpush1.bf16.msra.mxu0 %v3686_v2  ;;  %1589 = vmatpush1.bf16.msra.mxu1 %v3689_v3  ;;  %v3779_v2 = vld [vmem:[#allocation5 + $0x104] ss:$16 sps:$4 sm:$0xff]   ;;  %v3782_v3 = vld [vmem:[#allocation5 + $0x10c] ss:$16 sps:$4 sm:$0xff]  }
  0xe2   :  { %1426 = vmatprep.subr.bf16.mxu0 %v3694_v4  ;;  %1590 = vmatprep.subr.bf16.mxu1 %v3697_v5  ;;  %v3777_v4 = vld [vmem:[#allocation5 + $0x100] ss:$16 sps:$4 sm:$0xff]   ;;  %v3780_v5 = vld [vmem:[#allocation5 + $0x108] ss:$16 sps:$4 sm:$0xff]  }
  0xe5   :  { %1427 = vmatpush1.bf16.msra.mxu0 %v3692_v6  ;;  %1591 = vmatpush1.bf16.msra.mxu1 %v3695_v7  ;;  %v3785_v6 = vld [vmem:[#allocation5 + $0x124] ss:$16 sps:$4 sm:$0xff]   ;;  %v3788_v7 = vld [vmem:[#allocation5 + $0x12c] ss:$16 sps:$4 sm:$0xff]  }
  0xe6   :  { %1428 = vmatprep.subr.bf16.mxu0 %v3700_v8  ;;  %1592 = vmatprep.subr.bf16.mxu1 %v3703_v10  ;;  %v3783_v8 = vld [vmem:[#allocation5 + $0x120] ss:$16 sps:$4 sm:$0xff]   ;;  %v3786_v10 = vld [vmem:[#allocation5 + $0x128] ss:$16 sps:$4 sm:$0xff]  }
  0xe9   :  { %1429 = vmatpush1.bf16.msra.mxu0 %v3698_v11  ;;  %1593 = vmatpush1.bf16.msra.mxu1 %v3701_v12  ;;  %v3791_v11 = vld [vmem:[#allocation5 + $0x144] ss:$16 sps:$4 sm:$0xff]   ;;  %v3794_v12 = vld [vmem:[#allocation5 + $0x14c] ss:$16 sps:$4 sm:$0xff]  }
  0xea   :  { %1430 = vmatprep.subr.bf16.mxu0 %v3706_v13  ;;  %1594 = vmatprep.subr.bf16.mxu1 %v3709_v14  ;;  %v3789_v13 = vld [vmem:[#allocation5 + $0x140] ss:$16 sps:$4 sm:$0xff]   ;;  %v3792_v14 = vld [vmem:[#allocation5 + $0x148] ss:$16 sps:$4 sm:$0xff]  }
  0xed   :  { %1431 = vmatpush1.bf16.msra.mxu0 %v3704_v15  ;;  %1595 = vmatpush1.bf16.msra.mxu1 %v3707_v16  ;;  %v3797_v15 = vld [vmem:[#allocation5 + $0x164] ss:$16 sps:$4 sm:$0xff]   ;;  %v3800_v16 = vld [vmem:[#allocation5 + $0x16c] ss:$16 sps:$4 sm:$0xff]  }
  0xee   :  { %1432 = vmatprep.subr.bf16.mxu0 %v3712_v17  ;;  %1596 = vmatprep.subr.bf16.mxu1 %v3715_v18  ;;  %v3795_v17 = vld [vmem:[#allocation5 + $0x160] ss:$16 sps:$4 sm:$0xff]   ;;  %v3798_v18 = vld [vmem:[#allocation5 + $0x168] ss:$16 sps:$4 sm:$0xff]  }
  0xf1   :  { %1433 = vmatpush1.bf16.msra.mxu0 %v3710_v19  ;;  %1597 = vmatpush1.bf16.msra.mxu1 %v3713_v20  ;;  %v3803_v19 = vld [vmem:[#allocation5 + $0x184] ss:$16 sps:$4 sm:$0xff]   ;;  %v3806_v20 = vld [vmem:[#allocation5 + $0x18c] ss:$16 sps:$4 sm:$0xff]  }
  0xf2   :  { %1434 = vmatprep.subr.bf16.mxu0 %v3718_v21  ;;  %1598 = vmatprep.subr.bf16.mxu1 %v3721_v22  ;;  %v3801_v21 = vld [vmem:[#allocation5 + $0x180] ss:$16 sps:$4 sm:$0xff]   ;;  %v3804_v22 = vld [vmem:[#allocation5 + $0x188] ss:$16 sps:$4 sm:$0xff]  }
  0xf5   :  { %1435 = vmatpush1.bf16.msra.mxu0 %v3716_v24  ;;  %1599 = vmatpush1.bf16.msra.mxu1 %v3719_v25  ;;  %v3809_v24 = vld [vmem:[#allocation5 + $0x1a4] ss:$16 sps:$4 sm:$0xff]   ;;  %v3812_v25 = vld [vmem:[#allocation5 + $0x1ac] ss:$16 sps:$4 sm:$0xff]  }
  0xf6   :  { %1445 = vmatprep.subr.bf16.mxu0 %v3725_v9  ;;  %1609 = vmatprep.subr.bf16.mxu1 %v3728_v27  ;;  %v3807_v9 = vld [vmem:[#allocation5 + $0x1a0] ss:$16 sps:$4 sm:$0xff]   ;;  %v3810_v27 = vld [vmem:[#allocation5 + $0x1a8] ss:$16 sps:$4 sm:$0xff]  }
  0xf8   :  { %1437 = vmatmul.mubr.bf16.vlgmr.msra.gmra.mrb[0].mxu0 %v117_v30  ;;  %1601 = vmatmul.mubr.bf16.vlgmr.msra.gmra.mrb[0].mxu1 %v117_v30  ;;  %v3813_v30 = vld [vmem:[#allocation5 + $0x1c0] ss:$16 sps:$4 sm:$0xff]  }
  0xf9   :  { %1446 = vmatpush1.bf16.msra.mxu0 %v3723_v28  ;;  %1610 = vmatpush1.bf16.msra.mxu1 %v3726_v29  ;;  %v3815_v28 = vld [vmem:[#allocation5 + $0x1c4] ss:$16 sps:$4 sm:$0xff]   ;;  %v3818_v29 = vld [vmem:[#allocation5 + $0x1cc] ss:$16 sps:$4 sm:$0xff]  }
  0xfa   :  { %1477 = vmatprep.mubr.bf16.mxu0 %v4055_v34  ;;  %1641 = vmatprep.mubr.bf16.mxu1 %v4055_v34  ;;  %v3819_v34 = vld [vmem:[#allocation5 + $0x1e0] ss:$16 sps:$4 sm:$0xff]  }
  0xfb   :  { %2448 = vmatprep.subr.bf16.mxu0 %v3731_v31  ;;  %2530 = vmatprep.subr.bf16.mxu1 %v3734_v32  ;;  %v3816_v31 = vld [vmem:[#allocation5 + $0x1c8] ss:$16 sps:$4 sm:$0xff]   ;;  %v3821_v32 = vld [vmem:[#allocation5 + $0x1e4] ss:$16 sps:$4 sm:$0xff]  }
 0x104   :  { %3176 = vmatmul.mubr.msk.bf16.vlgmr.msra.gmra.mrb[0].mxu0 %vm1318_vm0, %v119_v37  ;;  %3177 = vmatmul.mubr.msk.bf16.vlgmr.msra.gmra.mrb[0].mxu1 %vm1318_vm0, %v119_v37  ;;  %v320_v37 = vsub.s32 0, %v4140_v43 }
 0x105   :  { %2449 = vmatpush1.bf16.msra.mxu0 %v3729_v35  ;;  %2531 = vmatpush1.bf16.msra.mxu1 %v3732_v36  ;;  %v3827_v35 = vld [vmem:[#allocation5 + $0x204] ss:$16 sps:$4 sm:$0xff]   ;;  %v3830_v36 = vld [vmem:[#allocation5 + $0x20c] ss:$16 sps:$4 sm:$0xff]  }
 0x106   :  { %2450 = vmatprep.subr.bf16.mxu0 %v3737_v38  ;;  %2532 = vmatprep.subr.bf16.mxu1 %v3740_v39  ;;  %v4176_v38 = vld [vmem:[%s4224_s2] sm:$0xf]  ;;  %v324_v39 = vsub.s32 1, %v4140_v43 }
 0x109   :  { %2451 = vmatpush1.bf16.msra.mxu0 %v3735_v40  ;;  %2533 = vmatpush1.bf16.msra.mxu1 %v3738_v41  ;;  %v332_v40 = vsub.s32 3, %v4140_v43  ;;  %v321_v41 = vrot.slane %v4176_v38, %v320_v37 }
 0x10a   :  { %2452 = vmatprep.subr.bf16.mxu0 %v3743_v23  ;;  %2534 = vmatprep.subr.bf16.mxu1 %v3746_v42  ;;  %v325_v23 = vrot.slane %v4176_v38, %v324_v39 }
 0x10b   :  { %v333_v42 = vrot.slane %v4176_v38, %v332_v40 }
 0x10d   :  { %2453 = vmatpush1.bf16.msra.mxu0 %v3741_v44  ;;  %2535 = vmatpush1.bf16.msra.mxu1 %v3744_v45 }
 0x10e   :  { %2454 = vmatprep.subr.bf16.mxu0 %v3749_v46  ;;  %2536 = vmatprep.subr.bf16.mxu1 %v3752_v47 }
 0x111   :  { %2455 = vmatpush1.bf16.msra.mxu0 %v3747_v49  ;;  %2537 = vmatpush1.bf16.msra.mxu1 %v3750_v48 }
 0x112   :  { %2456 = vmatprep.subr.bf16.mxu0 %v3755_v50  ;;  %2538 = vmatprep.subr.bf16.mxu1 %v3758_v51 }
 0x115   :  { %2457 = vmatpush1.bf16.msra.mxu0 %v3753_v52  ;;  %2539 = vmatpush1.bf16.msra.mxu1 %v3756_v53 }
 0x116   :  { %2458 = vmatprep.subr.bf16.mxu0 %v3761_v54  ;;  %2540 = vmatprep.subr.bf16.mxu1 %v3764_v55 }
 0x119   :  { %2459 = vmatpush1.bf16.msra.mxu0 %v3759_v56  ;;  %2541 = vmatpush1.bf16.msra.mxu1 %v3762_v57 }
 0x11a   :  { %2460 = vmatprep.subr.bf16.mxu0 %v3767_v58  ;;  %2542 = vmatprep.subr.bf16.mxu1 %v3770_v59  ;;  %v3825_v59 = vld [vmem:[#allocation5 + $0x200] ss:$16 sps:$4 sm:$0xff]  }
 0x11d   :  { %2461 = vmatpush1.bf16.msra.mxu0 %v3765_v60  ;;  %2543 = vmatpush1.bf16.msra.mxu1 %v3768_v61  ;;  %v3828_v60 = vld [vmem:[#allocation5 + $0x208] ss:$16 sps:$4 sm:$0xff]  }
 0x11e   :  { %2462 = vmatprep.subr.bf16.mxu0 %v3773_v62  ;;  %2544 = vmatprep.subr.bf16.mxu1 %v3776_v63  ;;  %v3833_v62 = vld [vmem:[#allocation5 + $0x224] ss:$16 sps:$4 sm:$0xff]   ;;  %v3836_v63 = vld [vmem:[#allocation5 + $0x22c] ss:$16 sps:$4 sm:$0xff]  }
 0x121   :  { %2463 = vmatpush1.bf16.msra.mxu0 %v3771_v0  ;;  %2545 = vmatpush1.bf16.msra.mxu1 %v3774_v1  ;;  %v3831_v1 = vld [vmem:[#allocation5 + $0x220] ss:$16 sps:$4 sm:$0xff]  }
 0x122   :  { %2464 = vmatprep.subr.bf16.mxu0 %v3779_v2  ;;  %2546 = vmatprep.subr.bf16.mxu1 %v3782_v3  ;;  %v3834_v2 = vld [vmem:[#allocation5 + $0x228] ss:$16 sps:$4 sm:$0xff]   ;;  %v3839_v3 = vld [vmem:[#allocation5 + $0x244] ss:$16 sps:$4 sm:$0xff]  }
 0x125   :  { %2465 = vmatpush1.bf16.msra.mxu0 %v3777_v4  ;;  %2547 = vmatpush1.bf16.msra.mxu1 %v3780_v5  ;;  %v3842_v4 = vld [vmem:[#allocation5 + $0x24c] ss:$16 sps:$4 sm:$0xff]   ;;  %v3837_v5 = vld [vmem:[#allocation5 + $0x240] ss:$16 sps:$4 sm:$0xff]  }
 0x126   :  { %2466 = vmatprep.subr.bf16.mxu0 %v3785_v6  ;;  %2548 = vmatprep.subr.bf16.mxu1 %v3788_v7  ;;  %v3840_v6 = vld [vmem:[#allocation5 + $0x248] ss:$16 sps:$4 sm:$0xff]   ;;  %v3845_v7 = vld [vmem:[#allocation5 + $0x264] ss:$16 sps:$4 sm:$0xff]  }
 0x129   :  { %2467 = vmatpush1.bf16.msra.mxu0 %v3783_v8  ;;  %2549 = vmatpush1.bf16.msra.mxu1 %v3786_v10  ;;  %v3848_v8 = vld [vmem:[#allocation5 + $0x26c] ss:$16 sps:$4 sm:$0xff]   ;;  %v3843_v10 = vld [vmem:[#allocation5 + $0x260] ss:$16 sps:$4 sm:$0xff]  }
 0x12a   :  { %2468 = vmatprep.subr.bf16.mxu0 %v3791_v11  ;;  %2550 = vmatprep.subr.bf16.mxu1 %v3794_v12  ;;  %v3846_v11 = vld [vmem:[#allocation5 + $0x268] ss:$16 sps:$4 sm:$0xff]   ;;  %v3851_v12 = vld [vmem:[#allocation5 + $0x284] ss:$16 sps:$4 sm:$0xff]  }
 0x12d   :  { %2469 = vmatpush1.bf16.msra.mxu0 %v3789_v13  ;;  %2551 = vmatpush1.bf16.msra.mxu1 %v3792_v14  ;;  %v3854_v13 = vld [vmem:[#allocation5 + $0x28c] ss:$16 sps:$4 sm:$0xff]   ;;  %v3849_v14 = vld [vmem:[#allocation5 + $0x280] ss:$16 sps:$4 sm:$0xff]  }
 0x12e   :  { %2470 = vmatprep.subr.bf16.mxu0 %v3797_v15  ;;  %2552 = vmatprep.subr.bf16.mxu1 %v3800_v16  ;;  %v3852_v15 = vld [vmem:[#allocation5 + $0x288] ss:$16 sps:$4 sm:$0xff]   ;;  %v3857_v16 = vld [vmem:[#allocation5 + $0x2a4] ss:$16 sps:$4 sm:$0xff]  }
 0x131   :  { %2471 = vmatpush1.bf16.msra.mxu0 %v3795_v17  ;;  %2553 = vmatpush1.bf16.msra.mxu1 %v3798_v18  ;;  %v3860_v17 = vld [vmem:[#allocation5 + $0x2ac] ss:$16 sps:$4 sm:$0xff]   ;;  %v3855_v18 = vld [vmem:[#allocation5 + $0x2a0] ss:$16 sps:$4 sm:$0xff]  }
 0x132   :  { %2472 = vmatprep.subr.bf16.mxu0 %v3803_v19  ;;  %2554 = vmatprep.subr.bf16.mxu1 %v3806_v20  ;;  %v3858_v19 = vld [vmem:[#allocation5 + $0x2a8] ss:$16 sps:$4 sm:$0xff]   ;;  %v3863_v20 = vld [vmem:[#allocation5 + $0x2c4] ss:$16 sps:$4 sm:$0xff]  }
 0x135   :  { %2473 = vmatpush1.bf16.msra.mxu0 %v3801_v21  ;;  %2555 = vmatpush1.bf16.msra.mxu1 %v3804_v22  ;;  %v3866_v21 = vld [vmem:[#allocation5 + $0x2cc] ss:$16 sps:$4 sm:$0xff]   ;;  %v3861_v22 = vld [vmem:[#allocation5 + $0x2c0] ss:$16 sps:$4 sm:$0xff]  }
 0x136   :  { %2474 = vmatprep.subr.bf16.mxu0 %v3809_v24  ;;  %2556 = vmatprep.subr.bf16.mxu1 %v3812_v25  ;;  %v3864_v24 = vld [vmem:[#allocation5 + $0x2c8] ss:$16 sps:$4 sm:$0xff]   ;;  %v3869_v25 = vld [vmem:[#allocation5 + $0x2e4] ss:$16 sps:$4 sm:$0xff]  }
 0x139   :  { %2475 = vmatpush1.bf16.msra.mxu0 %v3807_v9  ;;  %2557 = vmatpush1.bf16.msra.mxu1 %v3810_v27  ;;  %v3872_v9 = vld [vmem:[#allocation5 + $0x2ec] ss:$16 sps:$4 sm:$0xff]   ;;  %v3867_v27 = vld [vmem:[#allocation5 + $0x2e0] ss:$16 sps:$4 sm:$0xff]  }
 0x13a   :  { %2476 = vmatprep.subr.bf16.mxu0 %v3815_v28  ;;  %2558 = vmatprep.subr.bf16.mxu1 %v3818_v29  ;;  %v3870_v28 = vld [vmem:[#allocation5 + $0x2e8] ss:$16 sps:$4 sm:$0xff]   ;;  %v3875_v29 = vld [vmem:[#allocation5 + $0x304] ss:$16 sps:$4 sm:$0xff]  }
 0x13d   :  { %2477 = vmatpush1.bf16.msra.mxu0 %v3813_v30  ;;  %2559 = vmatpush1.bf16.msra.mxu1 %v3816_v31  ;;  %v3878_v30 = vld [vmem:[#allocation5 + $0x30c] ss:$16 sps:$4 sm:$0xff]   ;;  %v3873_v31 = vld [vmem:[#allocation5 + $0x300] ss:$16 sps:$4 sm:$0xff]  }
 0x13e   :  { %2478 = vmatprep.subr.bf16.mxu0 %v3821_v32  ;;  %2560 = vmatprep.subr.bf16.mxu1 %v3824_v33  ;;  %v3876_v32 = vld [vmem:[#allocation5 + $0x308] ss:$16 sps:$4 sm:$0xff]   ;;  %v3881_v33 = vld [vmem:[#allocation5 + $0x324] ss:$16 sps:$4 sm:$0xff]  }
 0x141   :  { %2479 = vmatpush1.bf16.msra.mxu0 %v3819_v34  ;;  %2561 = vmatpush1.bf16.msra.mxu1 %v3822_v26  ;;  %v3884_v34 = vld [vmem:[#allocation5 + $0x32c] ss:$16 sps:$4 sm:$0xff]   ;;  %v3879_v26 = vld [vmem:[#allocation5 + $0x320] ss:$16 sps:$4 sm:$0xff]  }
 0x142   :  { %2489 = vmatprep.subr.bf16.mxu0 %v3827_v35  ;;  %2571 = vmatprep.subr.bf16.mxu1 %v3830_v36  ;;  %v3882_v35 = vld [vmem:[#allocation5 + $0x328] ss:$16 sps:$4 sm:$0xff]   ;;  %v3887_v36 = vld [vmem:[#allocation5 + $0x344] ss:$16 sps:$4 sm:$0xff]  }
 0x1d7   :  { %v1479_v44 = vpop.f32.mrb[0].mxu0  ;;  %v4189_v45 = vpop.f32.mrb[0].mxu1 }
 0x1d8   :  { %v3383_v46 = vadd.f32 %v1479_v44, %v321_v41  ;;  %v1481_v47 = vpop.f32.mrb[1].mxu0  ;;  %v1645_v49 = vpop.f32.mrb[1].mxu1  ;;  %v3890_v41 = vld [vmem:[#allocation5 + $0x34c] ss:$16 sps:$4 sm:$0xff]   ;;  %v3893_v44 = vld [vmem:[#allocation5 + $0x364] ss:$16 sps:$4 sm:$0xff]  }
 0x1d9   :  { %v3384_v48 = vadd.f32 %v1481_v47, %v325_v23  ;;  %v3386_v50 = vadd.f32 %v1645_v49, %v333_v42  ;;  %v1483_v51 = vpop.f32.mrb[2].mxu0  ;;  %v1647_v52 = vpop.f32.mrb[2].mxu1  ;;  %v3885_v23 = vld [vmem:[#allocation5 + $0x340] ss:$16 sps:$4 sm:$0xff]   ;;  %v3888_v42 = vld [vmem:[#allocation5 + $0x348] ss:$16 sps:$4 sm:$0xff]  }
 0x1da   :  { %v1650_v53 = vmax.f32 %v3383_v46, 0.0  ;;  %v1484_v54 = vpop.f32.mrb[3].mxu0  ;;  %v1648_v55 = vpop.f32.mrb[3].mxu1  ;;  %v3896_v46 = vld [vmem:[#allocation5 + $0x36c] ss:$16 sps:$4 sm:$0xff]  }
 0x1db   :  { %v1651_v56 = vmax.f32 %v3384_v48, 0.0  ;;  %v1653_v57 = vmax.f32 %v3386_v50, 0.0  ;;  %v3891_v47 = vld [vmem:[#allocation5 + $0x360] ss:$16 sps:$4 sm:$0xff]   ;;  %v3894_v49 = vld [vmem:[#allocation5 + $0x368] ss:$16 sps:$4 sm:$0xff]  }
 0x1dc   :  { %v1654_v61 = vpack.c.bf16 %v1650_v53, %v1650_v53  ;;  %v3899_v48 = vld [vmem:[#allocation5 + $0x384] ss:$16 sps:$4 sm:$0xff]   ;;  %v3902_v50 = vld [vmem:[#allocation5 + $0x38c] ss:$16 sps:$4 sm:$0xff]   ;;  %v3897_v51 = vld [vmem:[#allocation5 + $0x380] ss:$16 sps:$4 sm:$0xff]  }
 0x1dd   :  { %v1655_v58 = vpack.c.bf16 %v1651_v56, %v1651_v56  ;;  %v1657_v0 = vpack.c.bf16 %v1653_v57, %v1653_v57  ;;  %v3900_v52 = vld [vmem:[#allocation5 + $0x388] ss:$16 sps:$4 sm:$0xff]   ;;  %v328_v53 = vsub.s32 2, %v4140_v43  ;;  %v3905_v54 = vld [vmem:[#allocation5 + $0x3a4] ss:$16 sps:$4 sm:$0xff]  }
 0x1de   :  { %v3908_v55 = vld [vmem:[#allocation5 + $0x3ac] ss:$16 sps:$4 sm:$0xff]   ;;  %v3903_v56 = vld [vmem:[#allocation5 + $0x3a0] ss:$16 sps:$4 sm:$0xff]   ;;  %v3906_v57 = vld [vmem:[#allocation5 + $0x3a8] ss:$16 sps:$4 sm:$0xff]  }
 0x1df   :  { %2480 = vmatprep.mubr.bf16.mxu0 %v1655_v58  ;;  %2562 = vmatprep.mubr.bf16.mxu1 %v1655_v58  ;;  %v329_v58 = vrot.slane %v4176_v38, %v328_v53  ;;  %v3921_v38 = vld [vmem:[#allocation7 + $0x40] sm:$0xff]  }
 0x1e0   :  { %2481 = vmatmul.mubr.bf16.vlgmr.msra.gmra.mrb[4].mxu0 %v1654_v61  ;;  %2563 = vmatmul.mubr.bf16.vlgmr.msra.gmra.mrb[4].mxu1 %v1654_v61  ;;  %v3909_v61 = vld [vmem:[#allocation5 + $0x3c0] ss:$16 sps:$4 sm:$0xff]  }
 0x1e1   :  { %2490 = vmatpush1.bf16.msra.mxu0 %v3825_v59  ;;  %2572 = vmatpush1.bf16.msra.mxu1 %v3828_v60  ;;  %v3911_v59 = vld [vmem:[#allocation5 + $0x3c4] ss:$16 sps:$4 sm:$0xff]   ;;  %v3914_v60 = vld [vmem:[#allocation5 + $0x3cc] ss:$16 sps:$4 sm:$0xff]  }
 0x1e2   :  { %2521 = vmatprep.mubr.bf16.mxu0 %v1657_v0  ;;  %2603 = vmatprep.mubr.bf16.mxu1 %v1657_v0  ;;  %v3917_v0 = vld [vmem:[#allocation5 + $0x3e4] ss:$16 sps:$4 sm:$0xff]  }
 0x1e3   :  { %2491 = vmatprep.subr.bf16.mxu0 %v3833_v62  ;;  %2573 = vmatprep.subr.bf16.mxu1 %v3836_v63  ;;  %v3912_v62 = vld [vmem:[#allocation5 + $0x3c8] ss:$16 sps:$4 sm:$0xff]   ;;  %v3385_v63 = vadd.f32 %v4189_v45, %v329_v58 }
 0x1e4   :  { %v3925_v45 = vld [vmem:[#allocation7 + $0x48] sm:$0xff]  }
 0x1e5   :  { %2492 = vmatpush1.bf16.msra.mxu0 %v3831_v1  ;;  %2574 = vmatpush1.bf16.msra.mxu1 %v3834_v2  ;;  %v3920_v1 = vld [vmem:[#allocation5 + $0x3ec] ss:$16 sps:$4 sm:$0xff]   ;;  %v3915_v2 = vld [vmem:[#allocation5 + $0x3e0] ss:$16 sps:$4 sm:$0xff]  }
 0x1e6   :  { %2493 = vmatprep.subr.bf16.mxu0 %v3839_v3  ;;  %2575 = vmatprep.subr.bf16.mxu1 %v3842_v4  ;;  %v3918_v3 = vld [vmem:[#allocation5 + $0x3e8] ss:$16 sps:$4 sm:$0xff]   ;;  %v1652_v4 = vmax.f32 %v3385_v63, 0.0 }
 0x1e9   :  { %2494 = vmatpush1.bf16.msra.mxu0 %v3837_v5  ;;  %2576 = vmatpush1.bf16.msra.mxu1 %v3840_v6  ;;  %v3922_v5 = vld [vmem:[#allocation7 + $0xc0] sm:$0xff]  }
 0x1ea   :  { %2495 = vmatprep.subr.bf16.mxu0 %v3845_v7  ;;  %2577 = vmatprep.subr.bf16.mxu1 %v3848_v8  ;;  %v3923_v6 = vld [vmem:[#allocation7] sm:$0xff]   ;;  %v1656_v8 = vpack.c.bf16 %v1652_v4, %v1652_v4 }
 0x1eb   :  { %v3924_v7 = vld [vmem:[#allocation7 + $0x80] sm:$0xff]  }
 0x1ed   :  { %2496 = vmatpush1.bf16.msra.mxu0 %v3843_v10  ;;  %2578 = vmatpush1.bf16.msra.mxu1 %v3846_v11  ;;  %v3926_v10 = vld [vmem:[#allocation7 + $0xc8] sm:$0xff]  }
 0x1ee   :  { %2497 = vmatprep.subr.bf16.mxu0 %v3851_v12  ;;  %2579 = vmatprep.subr.bf16.mxu1 %v3854_v13  ;;  %v3927_v11 = vld [vmem:[#allocation7 + $0x8] sm:$0xff]   ;;  %v3929_v13 = vld [vmem:[#allocation7 + $0x50] sm:$0xff]  }
 0x1ef   :  { %v3928_v12 = vld [vmem:[#allocation7 + $0x88] sm:$0xff]  }
 0x1f1   :  { %2498 = vmatpush1.bf16.msra.mxu0 %v3849_v14  ;;  %2580 = vmatpush1.bf16.msra.mxu1 %v3852_v15  ;;  %v3930_v14 = vld [vmem:[#allocation7 + $0xd0] sm:$0xff]  }
 0x1f2   :  { %2499 = vmatprep.subr.bf16.mxu0 %v3857_v16  ;;  %2581 = vmatprep.subr.bf16.mxu1 %v3860_v17  ;;  %v3931_v15 = vld [vmem:[#allocation7 + $0x10] sm:$0xff]   ;;  %v3933_v17 = vld [vmem:[#allocation7 + $0x58] sm:$0xff]  }
 0x1f3   :  { %v3932_v16 = vld [vmem:[#allocation7 + $0x90] sm:$0xff]  }
 0x1f5   :  { %2500 = vmatpush1.bf16.msra.mxu0 %v3855_v18  ;;  %2582 = vmatpush1.bf16.msra.mxu1 %v3858_v19  ;;  %v3934_v18 = vld [vmem:[#allocation7 + $0xd8] sm:$0xff]  }
 0x1f6   :  { %2501 = vmatprep.subr.bf16.mxu0 %v3863_v20  ;;  %2583 = vmatprep.subr.bf16.mxu1 %v3866_v21  ;;  %v3935_v19 = vld [vmem:[#allocation7 + $0x18] sm:$0xff]   ;;  %v3937_v21 = vld [vmem:[#allocation7 + $0x60] sm:$0xff]  }
 0x1f7   :  { %v3936_v20 = vld [vmem:[#allocation7 + $0x98] sm:$0xff]  }
 0x1f9   :  { %2502 = vmatpush1.bf16.msra.mxu0 %v3861_v22  ;;  %2584 = vmatpush1.bf16.msra.mxu1 %v3864_v24  ;;  %v3938_v22 = vld [vmem:[#allocation7 + $0xe0] sm:$0xff]  }
 0x1fa   :  { %2503 = vmatprep.subr.bf16.mxu0 %v3869_v25  ;;  %2585 = vmatprep.subr.bf16.mxu1 %v3872_v9  ;;  %v3939_v24 = vld [vmem:[#allocation7 + $0x20] sm:$0xff]   ;;  %v3941_v9 = vld [vmem:[#allocation7 + $0x68] sm:$0xff]  }
 0x1fb   :  { %v3940_v25 = vld [vmem:[#allocation7 + $0xa0] sm:$0xff]  }
 0x1fd   :  { %2504 = vmatpush1.bf16.msra.mxu0 %v3867_v27  ;;  %2586 = vmatpush1.bf16.msra.mxu1 %v3870_v28  ;;  %v3942_v27 = vld [vmem:[#allocation7 + $0xe8] sm:$0xff]  }
 0x1fe   :  { %2505 = vmatprep.subr.bf16.mxu0 %v3875_v29  ;;  %2587 = vmatprep.subr.bf16.mxu1 %v3878_v30  ;;  %v3943_v28 = vld [vmem:[#allocation7 + $0x28] sm:$0xff]   ;;  %v3945_v30 = vld [vmem:[#allocation7 + $0x70] sm:$0xff]  }
 0x1ff   :  { %v3944_v29 = vld [vmem:[#allocation7 + $0xa8] sm:$0xff]  }
 0x201   :  { %2506 = vmatpush1.bf16.msra.mxu0 %v3873_v31  ;;  %2588 = vmatpush1.bf16.msra.mxu1 %v3876_v32  ;;  %v3946_v31 = vld [vmem:[#allocation7 + $0xf0] sm:$0xff]  }
 0x202   :  { %2507 = vmatprep.subr.bf16.mxu0 %v3881_v33  ;;  %2589 = vmatprep.subr.bf16.mxu1 %v3884_v34  ;;  %v3947_v32 = vld [vmem:[#allocation7 + $0x30] sm:$0xff]   ;;  %v3949_v34 = vld [vmem:[#allocation7 + $0x78] sm:$0xff]  }
 0x203   :  { %v3948_v33 = vld [vmem:[#allocation7 + $0xb0] sm:$0xff]  }
 0x205   :  { %2508 = vmatpush1.bf16.msra.mxu0 %v3879_v26  ;;  %2590 = vmatpush1.bf16.msra.mxu1 %v3882_v35  ;;  %v3950_v26 = vld [vmem:[#allocation7 + $0xf8] sm:$0xff]  }
 0x206   :  { %2509 = vmatprep.subr.bf16.mxu0 %v3887_v36  ;;  %2591 = vmatprep.subr.bf16.mxu1 %v3890_v41  ;;  %v3951_v35 = vld [vmem:[#allocation7 + $0x38] sm:$0xff]   ;;  %v1786_v41 = vld [vmem:[%s4226_s4] sm:$0xf] }
 0x207   :  { %v3952_v36 = vld [vmem:[#allocation7 + $0xb8] sm:$0xff]  }
 0x209   :  { %2510 = vmatpush1.bf16.msra.mxu0 %v3885_v23  ;;  %2592 = vmatpush1.bf16.msra.mxu1 %v3888_v42  ;;  %v1791_v23 = vrot.slane %v1786_v41, %v320_v37  ;;  %v1799_v42 = vrot.slane %v1786_v41, %v328_v53 }
 0x20a   :  { %2511 = vmatprep.subr.bf16.mxu0 %v3893_v44  ;;  %2593 = vmatprep.subr.bf16.mxu1 %v3896_v46  ;;  %v1795_v44 = vrot.slane %v1786_v41, %v324_v39  ;;  %v1803_v46 = vrot.slane %v1786_v41, %v332_v40 }
 0x20d   :  { %2512 = vmatpush1.bf16.msra.mxu0 %v3891_v47  ;;  %2594 = vmatpush1.bf16.msra.mxu1 %v3894_v49 }
 0x20e   :  { %2513 = vmatprep.subr.bf16.mxu0 %v3899_v48  ;;  %2595 = vmatprep.subr.bf16.mxu1 %v3902_v50 }
 0x211   :  { %2514 = vmatpush1.bf16.msra.mxu0 %v3897_v51  ;;  %2596 = vmatpush1.bf16.msra.mxu1 %v3900_v52 }
 0x212   :  { %2515 = vmatprep.subr.bf16.mxu0 %v3905_v54  ;;  %2597 = vmatprep.subr.bf16.mxu1 %v3908_v55 }
 0x215   :  { %2516 = vmatpush1.bf16.msra.mxu0 %v3903_v56  ;;  %2598 = vmatpush1.bf16.msra.mxu1 %v3906_v57 }
 0x216   :  { %2517 = vmatprep.subr.bf16.mxu0 %v3911_v59  ;;  %2599 = vmatprep.subr.bf16.mxu1 %v3914_v60 }
 0x219   :  { %2518 = vmatpush1.bf16.msra.mxu0 %v3909_v61  ;;  %2600 = vmatpush1.bf16.msra.mxu1 %v3912_v62 }
 0x21a   :  { %2519 = vmatprep.subr.bf16.mxu0 %v3917_v0  ;;  %2601 = vmatprep.subr.bf16.mxu1 %v3920_v1  ;;  %v3306_v1 = vld [vmem:[%s4228_s6] ss:$0 sm:$0xff] }
 0x21d   :  { %2520 = vmatpush1.bf16.msra.mxu0 %v3915_v2  ;;  %2602 = vmatpush1.bf16.msra.mxu1 %v3918_v3 }
 0x21e   :  { %3339 = vmatprep.subr.bf16.mxu0 %v3921_v38  ;;  %3361 = vmatprep.subr.bf16.mxu1 %v3922_v5 }
 0x220   :  { %2522 = vmatmul.mubr.bf16.vlgmr.msra.gmra.mrb[4].mxu0 %v1656_v8  ;;  %2604 = vmatmul.mubr.bf16.vlgmr.msra.gmra.mrb[4].mxu1 %v1656_v8 }
 0x221   :  { %3340 = vmatpush3.bf16.msra.mxu0 %v3923_v6  ;;  %3362 = vmatpush3.bf16.msra.mxu1 %v3924_v7 }
 0x222   :  { %3341 = vmatprep.subr.bf16.mxu0 %v3925_v45  ;;  %3363 = vmatprep.subr.bf16.mxu1 %v3926_v10 }
 0x225   :  { %3342 = vmatpush3.bf16.msra.mxu0 %v3927_v11  ;;  %3364 = vmatpush3.bf16.msra.mxu1 %v3928_v12 }
 0x226   :  { %3343 = vmatprep.subr.bf16.mxu0 %v3929_v13  ;;  %3365 = vmatprep.subr.bf16.mxu1 %v3930_v14 }
 0x229   :  { %3344 = vmatpush3.bf16.msra.mxu0 %v3931_v15  ;;  %3366 = vmatpush3.bf16.msra.mxu1 %v3932_v16 }
 0x22a   :  { %3345 = vmatprep.subr.bf16.mxu0 %v3933_v17  ;;  %3367 = vmatprep.subr.bf16.mxu1 %v3934_v18 }
 0x22d   :  { %3346 = vmatpush3.bf16.msra.mxu0 %v3935_v19  ;;  %3368 = vmatpush3.bf16.msra.mxu1 %v3936_v20 }
 0x22e   :  { %3347 = vmatprep.subr.bf16.mxu0 %v3937_v21  ;;  %3369 = vmatprep.subr.bf16.mxu1 %v3938_v22 }
 0x231   :  { %3348 = vmatpush3.bf16.msra.mxu0 %v3939_v24  ;;  %3370 = vmatpush3.bf16.msra.mxu1 %v3940_v25 }
 0x232   :  { %3349 = vmatprep.subr.bf16.mxu0 %v3941_v9  ;;  %3371 = vmatprep.subr.bf16.mxu1 %v3942_v27 }
 0x235   :  { %3350 = vmatpush3.bf16.msra.mxu0 %v3943_v28  ;;  %3372 = vmatpush3.bf16.msra.mxu1 %v3944_v29 }
 0x236   :  { %3351 = vmatprep.subr.bf16.mxu0 %v3945_v30  ;;  %3373 = vmatprep.subr.bf16.mxu1 %v3946_v31 }
 0x239   :  { %3352 = vmatpush3.bf16.msra.mxu0 %v3947_v32  ;;  %3374 = vmatpush3.bf16.msra.mxu1 %v3948_v33 }
 0x23a   :  { %3353 = vmatprep.subr.bf16.mxu0 %v3949_v34  ;;  %3375 = vmatprep.subr.bf16.mxu1 %v3950_v26 }
 0x23d   :  { %3354 = vmatpush3.bf16.msra.mxu0 %v3951_v35  ;;  %3376 = vmatpush3.bf16.msra.mxu1 %v3952_v36 }
 0x2f3   :  { %v2523_v47 = vpop.f32.mrb[4].mxu0  ;;  %v2605_v49 = vpop.f32.mrb[4].mxu1 }
 0x2f4   :  { %v3387_v48 = vadd.f32 %v2523_v47, %v1791_v23  ;;  %v3389_v50 = vadd.f32 %v2605_v49, %v1799_v42  ;;  %v2525_v51 = vpop.f32.mrb[5].mxu0  ;;  %v2607_v52 = vpop.f32.mrb[5].mxu1 }
 0x2f5   :  { %v3388_v54 = vadd.f32 %v2525_v51, %v1795_v44  ;;  %v3390_v55 = vadd.f32 %v2607_v52, %v1803_v46  ;;  %v2527_v56 = vpop.f32.mrb[6].mxu0  ;;  %v2609_v57 = vpop.f32.mrb[6].mxu1 }
 0x2f6   :  { %v2612_v37 = vmax.f32 %v3387_v48, 0.0  ;;  %v2614_v58 = vmax.f32 %v3389_v50, 0.0  ;;  %v2528_v59 = vpop.f32.mrb[7].mxu0  ;;  %v2610_v53 = vpop.f32.mrb[7].mxu1 }
 0x2f7   :  { %v2613_v60 = vmax.f32 %v3388_v54, 0.0  ;;  %v2615_v61 = vmax.f32 %v3390_v55, 0.0 }
 0x2f8   :  { %v2616_v43 = vpack.c.bf16 %v2612_v37, %v2612_v37  ;;  %v2618_v40 = vpack.c.bf16 %v2614_v58, %v2614_v58 }
 0x2f9   :  { %v2617_v39 = vpack.c.bf16 %v2613_v60, %v2613_v60  ;;  %v2619_v62 = vpack.c.bf16 %v2615_v61, %v2615_v61 }
 0x2fb   :  { %2915 = vmatprep.mubr.bf16.mxu0 %v2617_v39  ;;  %2955 = vmatprep.mubr.bf16.mxu1 %v2619_v62 }
 0x2fc   :  { %2916 = vmatmul.mubr.bf16.vlgmr.msra.gmra.mrb[8].mxu0 %v2616_v43  ;;  %2956 = vmatmul.mubr.bf16.vlgmr.msra.gmra.mrb[8].mxu1 %v2618_v40 }
 0x3cf   :  { %v3355_v63 = vpop.f32.mrb[8].mxu0  ;;  %v3377_v0 = vpop.f32.mrb[8].mxu1 }
 0x3d0   :  { %v3356_v2 = vpop.f32.mrb[9].mxu0  ;;  %v3378_v3 = vpop.f32.mrb[9].mxu1 }
 0x3d1   :  { %v3357_v4 = vadd.f32 %v3356_v2, %v3355_v63  ;;  %v3379_v38 = vadd.f32 %v3378_v3, %v3377_v0  ;;  %v3358_v5 = vpop.f32.mrb[10].mxu0  ;;  %v3380_v6 = vpop.f32.mrb[10].mxu1 }
 0x3d2   :  { %v3359_v7 = vpop.f32.mrb[11].mxu0  ;;  %v3381_v8 = vpop.f32.mrb[11].mxu1 }
 0x3d3   :  { %v2918_v45 = vadd.f32 %v3357_v4, %v3306_v1 }
 0x3d5   :  { %v2958_v10 = vadd.f32 %v3379_v38, %v2918_v45 }
 0x3d7   :  { %2963 = vst [vmem:[#allocation8] sm:$0x3] %v2958_v10 }
 0x3d8   :  { %4030 = shalt.err (!%p4027_p0)
}
 0x3d9   :  { %s4031_s25 = scalar_lea.hbm %s4229_s7, 32 }
 0x3da   :  { %p4032_p1 = scmp.ne.s32.totalorder %s4229_s7, %s4031_s25  ;;  %p4035_p2 = scmp.lt.u32.totalorder %s4031_s25, %s4229_s7 }
 0x3dc   :  { %p4037_p3 = pnand %p4035_p2, %p4032_p1 }
 0x3de   :  { %4040 = shalt.err (!%p4037_p3)
}
 0x3df   :  { %2973 = dma.vmem_to_hbm [thread:$0]  %s2971_s23, 32, %s4229_s7, [#allocation4]  }
 0x3e0   :  { %4045 = dma.done.wait [#allocation4], 32  }
 0x3e1   :  { %4046 = vsyncadd [#allocation4], 4294967264 }
 0x3e2   :  { %2977 = vsyncpa [#allocation3], 1 }
 0x3e3   :  { %2978 = vsyncpa [#allocation6], 1 }
 0x3e4   :  { %2979 = vsyncpa [#allocation4], 1 }

</bundles_post_ra>
